<compile_context>
chip_gen: v7x
topology: tpu7x:2x2x1
jax: 0.10.0
libtpu: 0.0.40
codegen_flags: <defaults>
</compile_context>

<pallas_src>
import functools

import jax
import jax.numpy as jnp
from jax.experimental import pallas as pl
from jax.experimental.pallas import tpu as pltpu

_VMEM_LIMIT_BYTES = 48 * 1024 * 1024        # safe on v5e/v6e (128 MiB) and v7x (64 MiB)
_JOINT_TEMP_BUDGET = 20 * 1024 * 1024       # budget for f32 temps inside the joint kernel


def _round_up(x, m):
    return ((x + m - 1) // m) * m


def _pick_tile(m, cap=512):
    """Largest tile <= cap that divides m and is a multiple of 8 (or full m)."""
    if m <= cap:
        return m
    t = cap - (cap % 8)
    while t >= 8:
        if m % t == 0:
            return t
        t -= 8
    return m  # callers pre-pad m, so this fallback is only hit for odd shapes


def _pick_v_chunk(v, cap=1024):
    """Largest divisor of v that is <= cap (vocab chunk for online logsumexp)."""
    if v <= cap:
        return v
    for c in range(cap, 0, -1):
        if v % c == 0 and c >= 128:
            return c
    return v  # no decent divisor -> single chunk (tU budget adapts)


# ----------------------------------------------------------------------------
# Pallas kernel 1: batched (matmul + bias [+ relu]), tiled over (batch, M).
# Used for both conv layers (convs lowered to im2col patches @ weight).
# bf16 inputs/weights, f32 accumulation, bf16 output.
# ----------------------------------------------------------------------------
def _bmm_bias_kernel(x_ref, w_ref, b_ref, o_ref, *, relu):
    y = jnp.dot(x_ref[0], w_ref[...], preferred_element_type=jnp.float32) + b_ref[...]
    if relu:
        y = jnp.maximum(y, 0.0)
    o_ref[0] = y.astype(o_ref.dtype)


def batched_matmul_bias(x, w, b, *, relu=False, out_dtype=jnp.bfloat16):
    """x: (B, M, K) bf16, w: (K, N) bf16, b: (1, N) f32 -> (B, M, N) bf16."""
    B, M, K = x.shape
    N = w.shape[1]
    tM = _pick_tile(M, 512)
    grid = (B, M // tM)
    return pl.pallas_call(
        functools.partial(_bmm_bias_kernel, relu=relu),
        out_shape=jax.ShapeDtypeStruct((B, M, N), out_dtype),
        grid=grid,
        in_specs=[
            pl.BlockSpec((1, tM, K), lambda i, m: (i, m, 0)),
            pl.BlockSpec((K, N), lambda i, m: (0, 0)),
            pl.BlockSpec((1, N), lambda i, m: (0, 0)),
        ],
        out_specs=pl.BlockSpec((1, tM, N), lambda i, m: (i, m, 0)),
        compiler_params=pltpu.CompilerParams(
            dimension_semantics=("parallel", "parallel"),
            vmem_limit_bytes=_VMEM_LIMIT_BYTES),
    )(x, w, b)


# ----------------------------------------------------------------------------
# Pallas kernel 2: fused joint network + log_softmax + blank/target extraction.
# Grid = (B, U1p//tU, Tp//tT), T innermost ("arbitrary").
# Per (b, u, t):
#   pd = relu-free dec proj  (tU, J)   -- computed only at t == 0, cached in VMEM
#   pa = audio @ Wa + ba     (tT, J)
#   h  = relu(pa[:,None,:] + pd[None,:,:])            (tT, tU, J) f32
#   for each V chunk c:  logits_c = reshape(h) @ Wo[:, c] + bo[:, c]
#       online logsumexp (running max / sum-exp), accumulate target logit via
#       iota==target mask, take blank logit (last column of last chunk)
#   blank_lp / emit_lp = selected logit - lse          (tT, tU)
# Outputs are stored transposed, (B, U1p, Tp), so the store lane-dim is tT
# (lane-dense when tT >= 128).  The full (rows, V) logits never leave VMEM and
# its footprint is independent of V.
# ----------------------------------------------------------------------------
def _joint_loss_kernel(a_ref, d_ref, tgt_ref,
                       wa_ref, ba_ref, wd_ref, bd_ref, wo_ref, bo_ref,
                       blank_ref, emit_ref, pd_ref, *, Vc, n_vc):
    tT = a_ref.shape[1]
    tU = d_ref.shape[1]
    J = wa_ref.shape[1]

    # decoder projection: once per (b, u) tile, reused across the whole T axis
    @pl.when(pl.program_id(2) == 0)
    def _():
        pd_ref[...] = (jnp.dot(d_ref[0], wd_ref[...],
                               preferred_element_type=jnp.float32) + bd_ref[...])

    pa = (jnp.dot(a_ref[0], wa_ref[...],
                  preferred_element_type=jnp.float32) + ba_ref[...])      # (tT, J)
    pd = pd_ref[...]                                                      # (tU, J)

    h = jnp.maximum(pa[:, None, :] + pd[None, :, :], 0.0)                 # (tT, tU, J) f32
    h2 = h.reshape(tT * tU, J).astype(jnp.bfloat16)                       # fused M axis

    tgt = tgt_ref[...]                                                    # (1, tU, 1) int32
    neg_inf = jnp.float32(-jnp.inf)
    m = jnp.full((tT, tU, 1), neg_inf, jnp.float32)
    s = jnp.zeros((tT, tU, 1), jnp.float32)
    emit_acc = jnp.zeros((tT, tU, 1), jnp.float32)
    blank_logit = jnp.zeros((tT, tU, 1), jnp.float32)

    # chunked output projection + online logsumexp (VMEM independent of V)
    # TODO(synk): for very large vocab, stream Wo via an extra grid axis instead
    #             of keeping the full (J, V) weight resident in VMEM.
    for c in range(n_vc):
        wo_c = wo_ref[:, c * Vc:(c + 1) * Vc]                             # (J, Vc) bf16
        bo_c = bo_ref[:, c * Vc:(c + 1) * Vc]                             # (1, Vc) f32
        logits = (jnp.dot(h2, wo_c, preferred_element_type=jnp.float32)
                  + bo_c).reshape(tT, tU, Vc)                             # (tT, tU, Vc) f32
        cm = jnp.max(logits, axis=-1, keepdims=True)
        m_new = jnp.maximum(m, cm)
        s = s * jnp.exp(m - m_new) + jnp.sum(jnp.exp(logits - m_new),
                                             axis=-1, keepdims=True)
        m = m_new
        col = jax.lax.broadcasted_iota(jnp.int32, (tT, tU, Vc), 2) + c * Vc
        emit_acc = emit_acc + jnp.sum(jnp.where(col == tgt, logits, 0.0),
                                      axis=-1, keepdims=True)
        if c == n_vc - 1:
            # torchaudio rnnt_loss(blank=-1): blank = last vocab index
            blank_logit = logits[:, :, Vc - 1:Vc]

    lse = m + jnp.log(s)
    blank2 = (blank_logit - lse).reshape(tT, tU)
    emit2 = (emit_acc - lse).reshape(tT, tU)
    # lane-dense stores: output layout is (B, U1p, Tp)
    blank_ref[0] = blank2.T
    emit_ref[0] = emit2.T


def joint_log_probs(audio, dec, targets, wa, ba, wd, bd, wo, bo, *, tT, tU, Vc):
    """audio: (B, Tp, E) bf16, dec: (B, U1p, P) bf16, targets: (B, U1p, 1) i32
       -> (blank_lp, emit_lp), each (B, U1p, Tp) f32."""
    B, Tp, E = audio.shape
    _, U1p, P = dec.shape
    J = wa.shape[1]
    V = wo.shape[1]
    n_vc = V // Vc
    grid = (B, U1p // tU, Tp // tT)
    out_shape = (jax.ShapeDtypeStruct((B, U1p, Tp), jnp.float32),
                 jax.ShapeDtypeStruct((B, U1p, Tp), jnp.float32))
    return pl.pallas_call(
        functools.partial(_joint_loss_kernel, Vc=Vc, n_vc=n_vc),
        out_shape=out_shape,
        grid=grid,
        in_specs=[
            pl.BlockSpec((1, tT, E), lambda b, u, t: (b, t, 0)),
            pl.BlockSpec((1, tU, P), lambda b, u, t: (b, u, 0)),
            pl.BlockSpec((1, tU, 1), lambda b, u, t: (b, u, 0)),
            pl.BlockSpec((E, J), lambda b, u, t: (0, 0)),
            pl.BlockSpec((1, J), lambda b, u, t: (0, 0)),
            pl.BlockSpec((P, J), lambda b, u, t: (0, 0)),
            pl.BlockSpec((1, J), lambda b, u, t: (0, 0)),
            pl.BlockSpec((J, V), lambda b, u, t: (0, 0)),
            pl.BlockSpec((1, V), lambda b, u, t: (0, 0)),
        ],
        out_specs=(
            pl.BlockSpec((1, tU, tT), lambda b, u, t: (b, u, t)),
            pl.BlockSpec((1, tU, tT), lambda b, u, t: (b, u, t)),
        ),
        scratch_shapes=[pltpu.VMEM((tU, J), jnp.float32)],
        compiler_params=pltpu.CompilerParams(
            dimension_semantics=("parallel", "parallel", "arbitrary"),
            vmem_limit_bytes=_VMEM_LIMIT_BYTES),
    )(audio, dec, targets, wa, ba, wd, bd, wo, bo)


def _choose_joint_tiles(T_enc, U1, J, V):
    """VMEM-aware (tT, Tp, tU, U1p, Vc) selection for the joint kernel."""
    if T_enc <= 256:
        tT = _round_up(T_enc, 8)
        Tp = tT
    else:
        tT = 128
        Tp = _round_up(T_enc, 128)
    Vc = _pick_v_chunk(V, 1024)
    # f32 h + one logits chunk + exp temps per fused row, plus bf16 h2
    per_row_bytes = 4 * (J + 3 * Vc) + 2 * J
    max_rows = max(int(_JOINT_TEMP_BUDGET) // per_row_bytes, 64)
    tU_cap = max(8, (max_rows // tT) // 8 * 8)
    tU = min(_round_up(U1, 8), tU_cap)
    U1p = _round_up(U1, tU)
    return tT, Tp, tU, U1p, Vc


# ----------------------------------------------------------------------------
# RNN-T loss (torchaudio semantics: blank=-1 -> last vocab index, clamp=-1,
# reduction='mean').  Consumes the pre-gathered blank/emit log-probs from the
# fused joint kernel.  The u-recurrence per time step is a log-semiring
# associative scan (vectorized over u and batch); only the T loop is serial.
# TODO(synk): move this forward DP into a Pallas kernel (grid over B, fori over
#             T, alpha row in VMEM, pltpu.roll-based doubling for the u scan).
# ----------------------------------------------------------------------------
def rnnt_loss_mean(blank_lp, emit_lp, logit_lens, target_lens):
    # blank_lp: (B, T, U1) f32 ; emit_lp: (B, T, U) f32

    def per_example(blank_b, emit_b, t_len, u_len):
        # alpha[0, u] = cumulative emissions along the first frame
        a0 = jnp.concatenate(
            [jnp.zeros((1,), jnp.float32), jnp.cumsum(emit_b[0, :])])   # (U1,)

        def combine(x, y):
            ax, bx = x
            ay, by = y
            return ax + ay, jnp.logaddexp(by, bx + ay)

        def t_step(prev_row, xs):
            blank_prev, emit_t = xs
            c = prev_row + blank_prev                                   # from-below term (U1,)
            # a[u] = logaddexp(c[u], a[u-1] + e[u-1]) solved with an
            # associative scan over affine maps in the log semiring.
            acc_a, acc_b = jax.lax.associative_scan(combine, (emit_t, c[1:]))
            rest = jnp.logaddexp(acc_b, c[0] + acc_a)                   # (U,)
            row = jnp.concatenate([c[:1], rest])                        # (U1,)
            return row, row

        _, rows = jax.lax.scan(t_step, a0, (blank_b[:-1], emit_b[1:]))
        alpha = jnp.concatenate([a0[None, :], rows], axis=0)            # (T, U1)
        final = alpha[t_len - 1, u_len] + blank_b[t_len - 1, u_len]
        return -final

    losses = jax.vmap(per_example)(blank_lp, emit_lp, logit_lens, target_lens)
    return jnp.mean(losses)


# ----------------------------------------------------------------------------
# Full RNNTModel.forward
# ----------------------------------------------------------------------------
def rnnt_forward(params, mel_features, mel_feature_lens, input_ids,
                 input_id_lens, blank_idx):
    B, n_mels, T_mel = mel_features.shape
    U = input_ids.shape[1]
    U1 = U + 1
    K = 3
    P = params["w_pred"].shape[1]
    J = params["w_aud"].shape[1]
    V = params["w_out"].shape[1]

    # encoder output length (Conv1d k=3, s=2, p=1)
    T_enc = (T_mel + 2 * 1 - K) // 2 + 1
    tT, Tp, tU, U1p, Vc = _choose_joint_tiles(T_enc, U1, J, V)

    # ---- encoder: Conv1d(n_mels -> ENC_DIM, k=3, s=2, p=1) + ReLU ----------
    # TODO(synk): fold the im2col (pad/gather/transpose) into the conv kernel
    # via 3 shifted accumulated matmuls to remove this HBM round trip.
    xp = jnp.pad(mel_features, ((0, 0), (0, 0), (1, 1)))
    t_idx = 2 * jnp.arange(T_enc)[:, None] + jnp.arange(K)[None, :]     # (T_enc, 3)
    patches = xp[:, :, t_idx]                                           # (B, n_mels, T_enc, 3)
    patches = jnp.transpose(patches, (0, 2, 1, 3)).reshape(B, T_enc, n_mels * K)
    patches = jnp.pad(patches.astype(jnp.bfloat16),
                      ((0, 0), (0, Tp - T_enc), (0, 0)))                # pre-padded to Tp
    audio = batched_matmul_bias(patches, params["w_enc"], params["b_enc"],
                                relu=True)                              # (B, Tp, E) bf16
    audio_lens = (mel_feature_lens - 1) // 2 + 1                        # encoder.calc_output_lens

    # ---- predictor: prepend blank, Embedding + causal Conv1d(k=3) + ReLU ----
    prepended = jnp.concatenate(
        [jnp.full((B, 1), blank_idx, dtype=input_ids.dtype), input_ids], axis=1)  # (B, U1)
    emb_seq = params["emb"][prepended]                                  # (B, U1, P) f32
    ep = jnp.pad(emb_seq, ((0, 0), (K - 1, 0), (0, 0)))                 # causal left pad
    u_idx = jnp.arange(U1)[:, None] + jnp.arange(K)[None, :]
    pp = ep[:, u_idx, :].reshape(B, U1, K * P)
    pp = jnp.pad(pp.astype(jnp.bfloat16), ((0, 0), (0, U1p - U1), (0, 0)))
    dec = batched_matmul_bias(pp, params["w_pred"], params["b_pred"],
                              relu=True)                                # (B, U1p, P) bf16

    # ---- target ids for in-kernel emit selection (no one-hot in HBM) -------
    targets = jnp.pad(input_ids.astype(jnp.int32),
                      ((0, 0), (0, U1p - U)))[:, :, None]               # (B, U1p, 1)

    # ---- fused joint + log_softmax + blank/target gather (Pallas hot path) --
    blank_out, emit_out = joint_log_probs(
        audio, dec, targets,
        params["w_aud"], params["b_aud"],
        params["w_dec"], params["b_dec"],
        params["w_out"], params["b_out"],
        tT=tT, tU=tU, Vc=Vc)                                            # (B, U1p, Tp) each

    blank_lp = jnp.swapaxes(blank_out, 1, 2)[:, :T_enc, :U1]            # (B, T, U1)
    emit_lp = jnp.swapaxes(emit_out, 1, 2)[:, :T_enc, :U]               # (B, T, U)

    # ---- RNN-T loss (mean over batch) --------------------------------------
    loss = rnnt_loss_mean(blank_lp, emit_lp,
                          audio_lens.astype(jnp.int32),
                          input_id_lens.astype(jnp.int32))
    return loss


# ----------------------------------------------------------------------------
# Deterministic parameter construction + driver
# ----------------------------------------------------------------------------
def make_params(key, n_mels, enc_dim, pred_dim, joint_dim, vocab):
    ks = jax.random.split(key, 6)

    def w(k, shape, fan_in, dtype=jnp.bfloat16):
        return (jax.random.normal(k, shape, jnp.float32)
                / jnp.sqrt(fan_in)).astype(dtype)

    return {
        # MXU weights stored in bf16 once (no per-step casts); biases f32.
        "w_enc":  w(ks[0], (n_mels * 3, enc_dim), n_mels * 3),
        "b_enc":  jnp.zeros((1, enc_dim), jnp.float32),
        "emb":    w(ks[1], (vocab, pred_dim), pred_dim, jnp.float32),
        "w_pred": w(ks[2], (pred_dim * 3, pred_dim), pred_dim * 3),
        "b_pred": jnp.zeros((1, pred_dim), jnp.float32),
        "w_aud":  w(ks[3], (enc_dim, joint_dim), enc_dim),
        "b_aud":  jnp.zeros((1, joint_dim), jnp.float32),
        "w_dec":  w(ks[4], (pred_dim, joint_dim), pred_dim),
        "b_dec":  jnp.zeros((1, joint_dim), jnp.float32),
        "w_out":  w(ks[5], (joint_dim, vocab), joint_dim),
        "b_out":  jnp.zeros((1, vocab), jnp.float32),
    }


if __name__ == "__main__":
    B, N_MELS, T_MEL = 2, 16, 16
    U, V = 8, 16
    ENC_DIM = PRED_DIM = JOINT_DIM = 32
    BLANK_IDX = V - 1

    root = jax.random.PRNGKey(0)
    k_mel, k_ids, k_par = jax.random.split(root, 3)

    mel_features = jax.random.normal(k_mel, (B, N_MELS, T_MEL), jnp.float32)
    mel_feature_lens = jnp.array([16, 12], dtype=jnp.int32)
    input_ids = jax.random.randint(k_ids, (B, U), 0, V - 1, dtype=jnp.int32)
    input_id_lens = jnp.array([8, 6], dtype=jnp.int32)

    params = make_params(k_par, N_MELS, ENC_DIM, PRED_DIM, JOINT_DIM, V)

    loss_fn = jax.jit(functools.partial(rnnt_forward, blank_idx=BLANK_IDX))
    loss = loss_fn(params, mel_features, mel_feature_lens, input_ids, input_id_lens)
    jax.block_until_ready(loss)

    assert jnp.isfinite(loss), "loss is not finite"
    print("KERNEL_OK")
</pallas_src>

<mosaic_0001>
module attributes {stable_mosaic.version = 11 : i64} {
  func.func @_bmm_bias_kernel(%arg0: i32, %arg1: i32, %arg2: memref<1x16x96xbf16, #tpu.memory_space<vmem>>, %arg3: memref<96x32xbf16, #tpu.memory_space<vmem>>, %arg4: memref<1x32xf32, #tpu.memory_space<vmem>>, %arg5: memref<1x16x32xbf16, #tpu.memory_space<vmem>>) attributes {dimension_semantics = [#tpu.dimension_semantics<parallel>, #tpu.dimension_semantics<parallel>], iteration_bounds = array<i64: 2, 1>, scalar_prefetch = 0 : i64, scratch_operands = 0 : i64, tpu.core_type = #tpu.core_type<tc>, window_params = [{transform_indices = @transform_0, window_bounds = array<i64: 1, 16, 96>}, {pipeline_mode = #tpu.pipeline_mode<synchronous>, transform_indices = @transform_1, window_bounds = array<i64: 96, 32>}, {pipeline_mode = #tpu.pipeline_mode<synchronous>, transform_indices = @transform_2, window_bounds = array<i64: 1, 32>}, {transform_indices = @transform_3, window_bounds = array<i64: 1, 16, 32>}]} {
    %c0 = arith.constant 0 : index
    %c0_0 = arith.constant 0 : index
    %c0_1 = arith.constant 0 : index
    %0 = vector.load %arg2[%c0, %c0_0, %c0_1] : memref<1x16x96xbf16, #tpu.memory_space<vmem>>, vector<1x16x96xbf16>
    %1 = vector.shape_cast %0 : vector<1x16x96xbf16> to vector<16x96xbf16>
    %c0_2 = arith.constant 0 : index
    %c0_3 = arith.constant 0 : index
    %2 = vector.load %arg3[%c0_2, %c0_3] : memref<96x32xbf16, #tpu.memory_space<vmem>>, vector<96x32xbf16>
    %cst = arith.constant dense<0.000000e+00> : vector<16x32xf32>
    %3 = tpu.matmul %1, %2, %cst {dimension_numbers = #tpu.dot_dimension_numbers<[1], [0], [0], [1], [0, 0, 1, 1], [], []>} : vector<16x96xbf16>, vector<96x32xbf16>, vector<16x32xf32> -> vector<16x32xf32>
    %c0_4 = arith.constant 0 : index
    %c0_5 = arith.constant 0 : index
    %4 = vector.load %arg4[%c0_4, %c0_5] : memref<1x32xf32, #tpu.memory_space<vmem>>, vector<1x32xf32>
    %5 = vector.broadcast %4 : vector<1x32xf32> to vector<16x32xf32>
    %6 = arith.addf %3, %5 : vector<16x32xf32>
    %cst_6 = arith.constant 0.000000e+00 : f32
    %7 = vector.broadcast %cst_6 : f32 to vector<16x32xf32>
    %8 = arith.maximumf %6, %7 : vector<16x32xf32>
    %9 = arith.truncf %8 : vector<16x32xf32> to vector<16x32xbf16>
    %c0_7 = arith.constant 0 : index
    %c0_8 = arith.constant 0 : index
    %c0_9 = arith.constant 0 : index
    %10 = vector.load %arg5[%c0_7, %c0_8, %c0_9] : memref<1x16x32xbf16, #tpu.memory_space<vmem>>, vector<1x16x32xbf16>
    %11 = vector.shape_cast %10 : vector<1x16x32xbf16> to vector<16x32xbf16>
    %12 = vector.shape_cast %9 : vector<16x32xbf16> to vector<1x16x32xbf16>
    tpu.vector_store %arg5[%c0_7, %c0_8, %c0_9], %12 {strides = array<i32>} : memref<1x16x32xbf16, #tpu.memory_space<vmem>>, vector<1x16x32xbf16>,
    return
  }
  func.func @transform_0(%arg0: i32, %arg1: i32) -> (i32, i32, i32) {
    %c0_i32 = arith.constant 0 : i32
    %c0_i32_0 = arith.constant 0 : i32
    return %arg0, %arg1, %c0_i32 : i32, i32, i32
  }
  func.func @transform_1(%arg0: i32, %arg1: i32) -> (i32, i32) {
    %c0_i32 = arith.constant 0 : i32
    %c0_i32_0 = arith.constant 0 : i32
    %c0_i32_1 = arith.constant 0 : i32
    return %c0_i32, %c0_i32_0 : i32, i32
  }
  func.func @transform_2(%arg0: i32, %arg1: i32) -> (i32, i32) {
    %c0_i32 = arith.constant 0 : i32
    %c0_i32_0 = arith.constant 0 : i32
    %c0_i32_1 = arith.constant 0 : i32
    return %c0_i32, %c0_i32_0 : i32, i32
  }
  func.func @transform_3(%arg0: i32, %arg1: i32) -> (i32, i32, i32) {
    %c0_i32 = arith.constant 0 : i32
    %c0_i32_0 = arith.constant 0 : i32
    return %arg0, %arg1, %c0_i32 : i32, i32, i32
  }
}

module attributes {stable_mosaic.version = 11 : i64} {
  func.func @_bmm_bias_kernel(%arg0: i32, %arg1: i32, %arg2: memref<1x8x48xbf16, #tpu.memory_space<vmem>>, %arg3: memref<48x32xbf16, #tpu.memory_space<vmem>>, %arg4: memref<1x32xf32, #tpu.memory_space<vmem>>, %arg5: memref<1x8x32xbf16, #tpu.memory_space<vmem>>) attributes {dimension_semantics = [#tpu.dimension_semantics<parallel>, #tpu.dimension_semantics<parallel>], iteration_bounds = array<i64: 2, 1>, scalar_prefetch = 0 : i64, scratch_operands = 0 : i64, tpu.core_type = #tpu.core_type<tc>, window_params = [{transform_indices = @transform_0, window_bounds = array<i64: 1, 8, 48>}, {pipeline_mode = #tpu.pipeline_mode<synchronous>, transform_indices = @transform_1, window_bounds = array<i64: 48, 32>}, {pipeline_mode = #tpu.pipeline_mode<synchronous>, transform_indices = @transform_2, window_bounds = array<i64: 1, 32>}, {transform_indices = @transform_3, window_bounds = array<i64: 1, 8, 32>}]} {
    %c0 = arith.constant 0 : index
    %c0_0 = arith.constant 0 : index
    %c0_1 = arith.constant 0 : index
    %0 = vector.load %arg2[%c0, %c0_0, %c0_1] : memref<1x8x48xbf16, #tpu.memory_space<vmem>>, vector<1x8x48xbf16>
    %1 = vector.shape_cast %0 : vector<1x8x48xbf16> to vector<8x48xbf16>
    %c0_2 = arith.constant 0 : index
    %c0_3 = arith.constant 0 : index
    %2 = vector.load %arg3[%c0_2, %c0_3] : memref<48x32xbf16, #tpu.memory_space<vmem>>, vector<48x32xbf16>
    %cst = arith.constant dense<0.000000e+00> : vector<8x32xf32>
    %3 = tpu.matmul %1, %2, %cst {dimension_numbers = #tpu.dot_dimension_numbers<[1], [0], [0], [1], [0, 0, 1, 1], [], []>} : vector<8x48xbf16>, vector<48x32xbf16>, vector<8x32xf32> -> vector<8x32xf32>
    %c0_4 = arith.constant 0 : index
    %c0_5 = arith.constant 0 : index
    %4 = vector.load %arg4[%c0_4, %c0_5] : memref<1x32xf32, #tpu.memory_space<vmem>>, vector<1x32xf32>
    %5 = vector.broadcast %4 : vector<1x32xf32> to vector<8x32xf32>
    %6 = arith.addf %3, %5 : vector<8x32xf32>
    %cst_6 = arith.constant 0.000000e+00 : f32
    %7 = vector.broadcast %cst_6 : f32 to vector<8x32xf32>
    %8 = arith.maximumf %6, %7 : vector<8x32xf32>
    %9 = arith.truncf %8 : vector<8x32xf32> to vector<8x32xbf16>
    %c0_7 = arith.constant 0 : index
    %c0_8 = arith.constant 0 : index
    %c0_9 = arith.constant 0 : index
    %10 = vector.load %arg5[%c0_7, %c0_8, %c0_9] : memref<1x8x32xbf16, #tpu.memory_space<vmem>>, vector<1x8x32xbf16>
    %11 = vector.shape_cast %10 : vector<1x8x32xbf16> to vector<8x32xbf16>
    %12 = vector.shape_cast %9 : vector<8x32xbf16> to vector<1x8x32xbf16>
    tpu.vector_store %arg5[%c0_7, %c0_8, %c0_9], %12 {strides = array<i32>} : memref<1x8x32xbf16, #tpu.memory_space<vmem>>, vector<1x8x32xbf16>,
    return
  }
  func.func @transform_0(%arg0: i32, %arg1: i32) -> (i32, i32, i32) {
    %c0_i32 = arith.constant 0 : i32
    %c0_i32_0 = arith.constant 0 : i32
    return %arg0, %arg1, %c0_i32 : i32, i32, i32
  }
  func.func @transform_1(%arg0: i32, %arg1: i32) -> (i32, i32) {
    %c0_i32 = arith.constant 0 : i32
    %c0_i32_0 = arith.constant 0 : i32
    %c0_i32_1 = arith.constant 0 : i32
    return %c0_i32, %c0_i32_0 : i32, i32
  }
  func.func @transform_2(%arg0: i32, %arg1: i32) -> (i32, i32) {
    %c0_i32 = arith.constant 0 : i32
    %c0_i32_0 = arith.constant 0 : i32
    %c0_i32_1 = arith.constant 0 : i32
    return %c0_i32, %c0_i32_0 : i32, i32
  }
  func.func @transform_3(%arg0: i32, %arg1: i32) -> (i32, i32, i32) {
    %c0_i32 = arith.constant 0 : i32
    %c0_i32_0 = arith.constant 0 : i32
    return %arg0, %arg1, %c0_i32 : i32, i32, i32
  }
}

module attributes {stable_mosaic.version = 11 : i64} {
  func.func @_joint_loss_kernel(%arg0: i32, %arg1: i32, %arg2: i32, %arg3: memref<1x8x32xbf16, #tpu.memory_space<vmem>>, %arg4: memref<1x16x32xbf16, #tpu.memory_space<vmem>>, %arg5: memref<1x16x1xi32, #tpu.memory_space<vmem>>, %arg6: memref<32x32xbf16, #tpu.memory_space<vmem>>, %arg7: memref<1x32xf32, #tpu.memory_space<vmem>>, %arg8: memref<32x32xbf16, #tpu.memory_space<vmem>>, %arg9: memref<1x32xf32, #tpu.memory_space<vmem>>, %arg10: memref<32x16xbf16, #tpu.memory_space<vmem>>, %arg11: memref<1x16xf32, #tpu.memory_space<vmem>>, %arg12: memref<1x16x8xf32, #tpu.memory_space<vmem>>, %arg13: memref<1x16x8xf32, #tpu.memory_space<vmem>>, %arg14: memref<16x32xf32, #tpu.memory_space<vmem>>) attributes {dimension_semantics = [#tpu.dimension_semantics<parallel>, #tpu.dimension_semantics<parallel>, #tpu.dimension_semantics<arbitrary>], iteration_bounds = array<i64: 2, 1, 1>, scalar_prefetch = 0 : i64, scratch_operands = 1 : i64, tpu.core_type = #tpu.core_type<tc>, window_params = [{transform_indices = @transform_0, window_bounds = array<i64: 1, 8, 32>}, {transform_indices = @transform_1, window_bounds = array<i64: 1, 16, 32>}, {transform_indices = @transform_2, window_bounds = array<i64: 1, 16, 1>}, {pipeline_mode = #tpu.pipeline_mode<synchronous>, transform_indices = @transform_3, window_bounds = array<i64: 32, 32>}, {pipeline_mode = #tpu.pipeline_mode<synchronous>, transform_indices = @transform_4, window_bounds = array<i64: 1, 32>}, {pipeline_mode = #tpu.pipeline_mode<synchronous>, transform_indices = @transform_5, window_bounds = array<i64: 32, 32>}, {pipeline_mode = #tpu.pipeline_mode<synchronous>, transform_indices = @transform_6, window_bounds = array<i64: 1, 32>}, {pipeline_mode = #tpu.pipeline_mode<synchronous>, transform_indices = @transform_7, window_bounds = array<i64: 32, 16>}, {pipeline_mode = #tpu.pipeline_mode<synchronous>, transform_indices = @transform_8, window_bounds = array<i64: 1, 16>}, {transform_indices = @transform_9, window_bounds = array<i64: 1, 16, 8>}, {transform_indices = @transform_10, window_bounds = array<i64: 1, 16, 8>}]} {
    %c0_i32 = arith.constant 0 : i32
    %0 = arith.cmpi eq, %arg2, %c0_i32 : i32
    %1 = arith.extui %0 : i1 to i32
    %c0_i32_0 = arith.constant 0 : i32
    %2 = arith.cmpi ne, %1, %c0_i32_0 : i32
    scf.if %2 {
      %c0_32 = arith.constant 0 : index
      %c0_33 = arith.constant 0 : index
      %c0_34 = arith.constant 0 : index
      %67 = vector.load %arg4[%c0_32, %c0_33, %c0_34] : memref<1x16x32xbf16, #tpu.memory_space<vmem>>, vector<1x16x32xbf16>
      %68 = vector.shape_cast %67 : vector<1x16x32xbf16> to vector<16x32xbf16>
      %c0_35 = arith.constant 0 : index
      %c0_36 = arith.constant 0 : index
      %69 = vector.load %arg8[%c0_35, %c0_36] : memref<32x32xbf16, #tpu.memory_space<vmem>>, vector<32x32xbf16>
      %cst_37 = arith.constant dense<0.000000e+00> : vector<16x32xf32>
      %70 = tpu.matmul %68, %69, %cst_37 {dimension_numbers = #tpu.dot_dimension_numbers<[1], [0], [0], [1], [0, 0, 1, 1], [], []>} : vector<16x32xbf16>, vector<32x32xbf16>, vector<16x32xf32> -> vector<16x32xf32>
      %c0_38 = arith.constant 0 : index
      %c0_39 = arith.constant 0 : index
      %71 = vector.load %arg9[%c0_38, %c0_39] : memref<1x32xf32, #tpu.memory_space<vmem>>, vector<1x32xf32>
      %72 = vector.broadcast %71 : vector<1x32xf32> to vector<16x32xf32>
      %73 = arith.addf %70, %72 : vector<16x32xf32>
      %c0_40 = arith.constant 0 : index
      %c0_41 = arith.constant 0 : index
      %74 = vector.load %arg14[%c0_40, %c0_41] : memref<16x32xf32, #tpu.memory_space<vmem>>, vector<16x32xf32>
      tpu.vector_store %arg14[%c0_40, %c0_41], %73 {strides = array<i32>} : memref<16x32xf32, #tpu.memory_space<vmem>>, vector<16x32xf32>,
    } else {
    }
    %c0 = arith.constant 0 : index
    %c0_1 = arith.constant 0 : index
    %c0_2 = arith.constant 0 : index
    %3 = vector.load %arg3[%c0, %c0_1, %c0_2] : memref<1x8x32xbf16, #tpu.memory_space<vmem>>, vector<1x8x32xbf16>
    %4 = vector.shape_cast %3 : vector<1x8x32xbf16> to vector<8x32xbf16>
    %c0_3 = arith.constant 0 : index
    %c0_4 = arith.constant 0 : index
    %5 = vector.load %arg6[%c0_3, %c0_4] : memref<32x32xbf16, #tpu.memory_space<vmem>>, vector<32x32xbf16>
    %cst = arith.constant dense<0.000000e+00> : vector<8x32xf32>
    %6 = tpu.matmul %4, %5, %cst {dimension_numbers = #tpu.dot_dimension_numbers<[1], [0], [0], [1], [0, 0, 1, 1], [], []>} : vector<8x32xbf16>, vector<32x32xbf16>, vector<8x32xf32> -> vector<8x32xf32>
    %c0_5 = arith.constant 0 : index
    %c0_6 = arith.constant 0 : index
    %7 = vector.load %arg7[%c0_5, %c0_6] : memref<1x32xf32, #tpu.memory_space<vmem>>, vector<1x32xf32>
    %8 = vector.broadcast %7 : vector<1x32xf32> to vector<8x32xf32>
    %9 = arith.addf %6, %8 : vector<8x32xf32>
    %c0_7 = arith.constant 0 : index
    %c0_8 = arith.constant 0 : index
    %10 = vector.load %arg14[%c0_7, %c0_8] : memref<16x32xf32, #tpu.memory_space<vmem>>, vector<16x32xf32>
    %11 = vector.shape_cast %9 : vector<8x32xf32> to vector<8x1x32xf32>
    %12 = vector.shape_cast %10 : vector<16x32xf32> to vector<1x16x32xf32>
    %13 = vector.broadcast %11 : vector<8x1x32xf32> to vector<8x16x32xf32>
    %14 = vector.broadcast %12 : vector<1x16x32xf32> to vector<8x16x32xf32>
    %15 = arith.addf %13, %14 : vector<8x16x32xf32>
    %cst_9 = arith.constant 0.000000e+00 : f32
    %16 = vector.broadcast %cst_9 : f32 to vector<8x16x32xf32>
    %17 = arith.maximumf %15, %16 : vector<8x16x32xf32>
    %18 = vector.shape_cast %17 : vector<8x16x32xf32> to vector<128x32xf32>
    %19 = arith.truncf %18 : vector<128x32xf32> to vector<128x32xbf16>
    %c0_10 = arith.constant 0 : index
    %c0_11 = arith.constant 0 : index
    %c0_12 = arith.constant 0 : index
    %20 = vector.load %arg5[%c0_10, %c0_11, %c0_12] : memref<1x16x1xi32, #tpu.memory_space<vmem>>, vector<1x16x1xi32>
    %cst_13 = arith.constant 0xFF800000 : f32
    %21 = vector.broadcast %cst_13 : f32 to vector<8x16x1xf32>
    %cst_14 = arith.constant 0.000000e+00 : f32
    %22 = vector.broadcast %cst_14 : f32 to vector<8x16x1xf32>
    %cst_15 = arith.constant 0.000000e+00 : f32
    %23 = vector.broadcast %cst_15 : f32 to vector<8x16x1xf32>
    %c0_16 = arith.constant 0 : index
    %c0_17 = arith.constant 0 : index
    %24 = vector.load %arg10[%c0_16, %c0_17] : memref<32x16xbf16, #tpu.memory_space<vmem>>, vector<32x16xbf16>
    %c0_18 = arith.constant 0 : index
    %c0_19 = arith.constant 0 : index
    %25 = vector.load %arg11[%c0_18, %c0_19] : memref<1x16xf32, #tpu.memory_space<vmem>>, vector<1x16xf32>
    %cst_20 = arith.constant dense<0.000000e+00> : vector<128x16xf32>
    %26 = tpu.matmul %19, %24, %cst_20 {dimension_numbers = #tpu.dot_dimension_numbers<[1], [0], [0], [1], [0, 0, 1, 1], [], []>} : vector<128x32xbf16>, vector<32x16xbf16>, vector<128x16xf32> -> vector<128x16xf32>
    %27 = vector.broadcast %25 : vector<1x16xf32> to vector<128x16xf32>
    %28 = arith.addf %26, %27 : vector<128x16xf32>
    %29 = vector.shape_cast %28 : vector<128x16xf32> to vector<8x16x16xf32>
    %cst_21 = arith.constant dense<0xFF800000> : vector<8x16xf32>
    %30 = vector.multi_reduction <maximumf>, %29, %cst_21 [2] : vector<8x16x16xf32> to vector<8x16xf32>
    %31 = vector.shape_cast %30 : vector<8x16xf32> to vector<8x16x1xf32>
    %32 = arith.maximumf %21, %31 : vector<8x16x1xf32>
    %33 = arith.subf %21, %32 : vector<8x16x1xf32>
    %34 = math.exp %33 : vector<8x16x1xf32>
    %35 = arith.mulf %22, %34 : vector<8x16x1xf32>
    %36 = vector.broadcast %32 : vector<8x16x1xf32> to vector<8x16x16xf32>
    %37 = arith.subf %29, %36 : vector<8x16x16xf32>
    %38 = math.exp %37 : vector<8x16x16xf32>
    %cst_22 = arith.constant dense<0.000000e+00> : vector<8x16xf32>
    %39 = vector.multi_reduction <add>, %38, %cst_22 [2] : vector<8x16x16xf32> to vector<8x16xf32>
    %40 = vector.shape_cast %39 : vector<8x16xf32> to vector<8x16x1xf32>
    %41 = arith.addf %35, %40 : vector<8x16x1xf32>
    %42 = tpu.iota {dimensions = array<i32: 2>} : vector<8x16x16xi32>
    %c0_i32_23 = arith.constant 0 : i32
    %43 = vector.broadcast %c0_i32_23 : i32 to vector<8x16x16xi32>
    %44 = arith.addi %42, %43 : vector<8x16x16xi32>
    %45 = vector.broadcast %20 : vector<1x16x1xi32> to vector<8x16x16xi32>
    %46 = arith.cmpi eq, %44, %45 : vector<8x16x16xi32>
    %cst_24 = arith.constant 0.000000e+00 : f32
    %47 = vector.broadcast %cst_24 : f32 to vector<8x16x16xf32>
    %48 = arith.select %46, %29, %47 : vector<8x16x16xi1>, vector<8x16x16xf32>
    %cst_25 = arith.constant dense<0.000000e+00> : vector<8x16xf32>
    %49 = vector.multi_reduction <add>, %48, %cst_25 [2] : vector<8x16x16xf32> to vector<8x16xf32>
    %50 = vector.shape_cast %49 : vector<8x16xf32> to vector<8x16x1xf32>
    %51 = arith.addf %23, %50 : vector<8x16x1xf32>
    %52 = vector.extract_strided_slice %29 {offsets = [0, 0, 15], sizes = [8, 16, 1], strides = [1, 1, 1]} : vector<8x16x16xf32> to vector<8x16x1xf32>
    %53 = math.log %41 : vector<8x16x1xf32>
    %54 = arith.addf %32, %53 : vector<8x16x1xf32>
    %55 = arith.subf %52, %54 : vector<8x16x1xf32>
    %56 = vector.shape_cast %55 : vector<8x16x1xf32> to vector<8x16xf32>
    %57 = arith.subf %51, %54 : vector<8x16x1xf32>
    %58 = vector.shape_cast %57 : vector<8x16x1xf32> to vector<8x16xf32>
    %59 = tpu.transpose %56, [1, 0] : vector<8x16xf32> -> vector<16x8xf32>
    %c0_26 = arith.constant 0 : index
    %c0_27 = arith.constant 0 : index
    %c0_28 = arith.constant 0 : index
    %60 = vector.load %arg12[%c0_26, %c0_27, %c0_28] : memref<1x16x8xf32, #tpu.memory_space<vmem>>, vector<1x16x8xf32>
    %61 = vector.shape_cast %60 : vector<1x16x8xf32> to vector<16x8xf32>
    %62 = vector.shape_cast %59 : vector<16x8xf32> to vector<1x16x8xf32>
    tpu.vector_store %arg12[%c0_26, %c0_27, %c0_28], %62 {strides = array<i32>} : memref<1x16x8xf32, #tpu.memory_space<vmem>>, vector<1x16x8xf32>,
    %63 = tpu.transpose %58, [1, 0] : vector<8x16xf32> -> vector<16x8xf32>
    %c0_29 = arith.constant 0 : index
    %c0_30 = arith.constant 0 : index
    %c0_31 = arith.constant 0 : index
    %64 = vector.load %arg13[%c0_29, %c0_30, %c0_31] : memref<1x16x8xf32, #tpu.memory_space<vmem>>, vector<1x16x8xf32>
    %65 = vector.shape_cast %64 : vector<1x16x8xf32> to vector<16x8xf32>
    %66 = vector.shape_cast %63 : vector<16x8xf32> to vector<1x16x8xf32>
    tpu.vector_store %arg13[%c0_29, %c0_30, %c0_31], %66 {strides = array<i32>} : memref<1x16x8xf32, #tpu.memory_space<vmem>>, vector<1x16x8xf32>,
    return
  }
  func.func @transform_0(%arg0: i32, %arg1: i32, %arg2: i32) -> (i32, i32, i32) {
    %c0_i32 = arith.constant 0 : i32
    %c0_i32_0 = arith.constant 0 : i32
    return %arg0, %arg2, %c0_i32 : i32, i32, i32
  }
  func.func @transform_1(%arg0: i32, %arg1: i32, %arg2: i32) -> (i32, i32, i32) {
    %c0_i32 = arith.constant 0 : i32
    %c0_i32_0 = arith.constant 0 : i32
    return %arg0, %arg1, %c0_i32 : i32, i32, i32
  }
  func.func @transform_2(%arg0: i32, %arg1: i32, %arg2: i32) -> (i32, i32, i32) {
    %c0_i32 = arith.constant 0 : i32
    %c0_i32_0 = arith.constant 0 : i32
    return %arg0, %arg1, %c0_i32 : i32, i32, i32
  }
  func.func @transform_3(%arg0: i32, %arg1: i32, %arg2: i32) -> (i32, i32) {
    %c0_i32 = arith.constant 0 : i32
    %c0_i32_0 = arith.constant 0 : i32
    %c0_i32_1 = arith.constant 0 : i32
    return %c0_i32, %c0_i32_0 : i32, i32
  }
  func.func @transform_4(%arg0: i32, %arg1: i32, %arg2: i32) -> (i32, i32) {
    %c0_i32 = arith.constant 0 : i32
    %c0_i32_0 = arith.constant 0 : i32
    %c0_i32_1 = arith.constant 0 : i32
    return %c0_i32, %c0_i32_0 : i32, i32
  }
  func.func @transform_5(%arg0: i32, %arg1: i32, %arg2: i32) -> (i32, i32) {
    %c0_i32 = arith.constant 0 : i32
    %c0_i32_0 = arith.constant 0 : i32
    %c0_i32_1 = arith.constant 0 : i32
    return %c0_i32, %c0_i32_0 : i32, i32
  }
  func.func @transform_6(%arg0: i32, %arg1: i32, %arg2: i32) -> (i32, i32) {
    %c0_i32 = arith.constant 0 : i32
    %c0_i32_0 = arith.constant 0 : i32
    %c0_i32_1 = arith.constant 0 : i32
    return %c0_i32, %c0_i32_0 : i32, i32
  }
  func.func @transform_7(%arg0: i32, %arg1: i32, %arg2: i32) -> (i32, i32) {
    %c0_i32 = arith.constant 0 : i32
    %c0_i32_0 = arith.constant 0 : i32
    %c0_i32_1 = arith.constant 0 : i32
    return %c0_i32, %c0_i32_0 : i32, i32
  }
  func.func @transform_8(%arg0: i32, %arg1: i32, %arg2: i32) -> (i32, i32) {
    %c0_i32 = arith.constant 0 : i32
    %c0_i32_0 = arith.constant 0 : i32
    %c0_i32_1 = arith.constant 0 : i32
    return %c0_i32, %c0_i32_0 : i32, i32
  }
  func.func @transform_9(%arg0: i32, %arg1: i32, %arg2: i32) -> (i32, i32, i32) {
    %c0_i32 = arith.constant 0 : i32
    return %arg0, %arg1, %arg2 : i32, i32, i32
  }
  func.func @transform_10(%arg0: i32, %arg1: i32, %arg2: i32) -> (i32, i32, i32) {
    %c0_i32 = arith.constant 0 : i32
    return %arg0, %arg1, %arg2 : i32, i32, i32
  }
}

</mosaic_0001>

<bundles_post_ra>
// kernel: rnnt_forward.4
= control target key start
LH: loop header
LB: loop body
LE: loop exit
PB: predicated region body
PF: predicated region fallthrough
CT: control target
= control target key end

     0   :  { %s546_s12 = smov 0   ;;  %s548_s13 = smov 0   ;;  %s600_s0 = inlined_call_operand.vmem [shape: bf16[2,16,96], index: 0, kind: input, shape index: {}]   ;;  %s601_s1 = inlined_call_operand.vmem [shape: bf16[96,32], index: 1, kind: input, shape index: {}]   ;;  %s602_s2 = inlined_call_operand.vmem [shape: f32[1,32], index: 2, kind: input, shape index: {}]   ;;  %s603_s3 = inlined_call_operand.vmem [shape: bf16[2,16,32], index: 3, kind: output, shape index: {}]  }
   0x1   :  { %s550_s14 = smov 0  }
   0x2 LB: > { %s25_s15 = sadd.s32 1, %s518_s13  ;;  %p422_p0 = scmp.ge.s32.totalorder %s522_s14, 1  ;;  %s522_s14 = sphi %s550_s14, %s13_s14   ;;  %s518_s13 = sphi %s548_s13, %s605_s13   ;;  %s514_s12 = sphi %s546_s12, %s604_s12  }
   0x3   : > { %p27_p1 = scmp.ge.s32.totalorder %s25_s15, 2  ;;  %p158_p2 = scmp.lt.s32.totalorder %s522_s14, 3 }
   0x5   : > { %s607_s15 = smov (%p27_p1, %s25_s15), 0  ;;  %p159_p3 = pnand %p422_p0, %p158_p2 }
   0x6   : > { %v493_v0 = vld [vmem:[%s601_s1] sm:$0xff] (!%p159_p3)   ;;  %v524_v1 = vmov (!%p159_p3), 0.0   ;;  %v494_v2 = vld [vmem:[%s601_s1 + $0x8] sm:$0xff] (!%p159_p3)   ;;  %vm525_vm0 = vmmov (!%p159_p3), 0   ;;  %p191_p4 = scmp.lt.s32.totalorder (!%p159_p3), %s514_s12, 1  ;;  %v495_v3 = vld [vmem:[%s601_s1 + $0x10] sm:$0xff] (!%p159_p3)  }
   0x7   : > { %162 = sbr.rel (%p159_p3) target bundleno = 252 (0xfc), region = 32  ;;  %451 = vmatprep.subr.bf16.mxu0 (!%p159_p3), %v524_v1  ;;  %463 = vmatprep.mubr.msk.bf16.mxu0 (!%p159_p3), %vm525_vm0, %v524_v1  ;;  %v496_v4 = vld [vmem:[%s601_s1 + $0x18] sm:$0xff] (!%p159_p3)   ;;  %v497_v5 = vld [vmem:[%s601_s1 + $0x20] sm:$0xff] (!%p159_p3)   ;;  %v498_v6 = vld [vmem:[%s601_s1 + $0x28] sm:$0xff] (!%p159_p3)   ;;  %vm273_vm1 = vcmask (!%p159_p3), 785408   ;;  %vm328_vm2 = vcmask (!%p159_p3), 257024  }
   0x8   : > { %452 = vmatpush3.bf16.msra.mxu0 (!%p159_p3), %v493_v0  ;;  %v427_v8 = vld [vmem:[%s602_s2] ss:$0 sm:$0xff] (!%p159_p3) }
   0x9   : > { %453 = vmatprep.subr.bf16.mxu0 (!%p159_p3), %v524_v1 }
   0xc   : > { %454 = vmatpush3.bf16.msra.mxu0 (!%p159_p3), %v494_v2 }
   0xd   : > { %455 = vmatprep.subr.bf16.mxu0 (!%p159_p3), %v524_v1 }
   0xe   : > { %s609_s12 = smov (!%p191_p4, %s514_s12), 1 }
   0xf   : > { %s440_s22 = sshll.u32 %s609_s12, 3 }
  0x10   : > { %s198_s25 = scalar_lea.vmem %s600_s0, %s440_s22  ;;  %456 = vmatpush3.bf16.msra.mxu0 %v495_v3  ;;  %s208_s9 = scalar_lea.vmem %s603_s3, %s440_s22 }
  0x11   : > { %457 = vmatprep.subr.bf16.mxu0 %v524_v1  ;;  %v499_v7 = vld [vmem:[%s198_s25] sm:$0xff]  }
  0x14   : > { %458 = vmatpush3.bf16.msra.mxu0 %v496_v4 }
  0x15   : > { %459 = vmatprep.subr.bf16.mxu0 %v524_v1 }
  0x18   : > { %460 = vmatpush3.bf16.msra.mxu0 %v497_v5 }
  0x19   : > { %461 = vmatprep.subr.bf16.mxu0 %v524_v1 }
  0x1c   : > { %462 = vmatpush3.bf16.msra.mxu0 %v498_v6 }
  0x1f   : > { %464 = vmatmul.mubr.msk.bf16.vlgmr.msra.gmra.mrb[0].mxu0 %vm273_vm1, %v499_v7 }
  0xf2   : > { %v311_v9 = vpop.f32.mrb[0].mxu0 }
  0xf3   : > { %v312_v10 = vadd.f32 %v427_v8, %v311_v9  ;;  %v465_v11 = vpop.f32.mrb[1].mxu0 }
  0xf4   : > { %v314_v12 = vpop.f32.mrb[2].mxu0 }
  0xf5   : > { %v318_v13 = vmax.f32 %v312_v10, 0.0  ;;  %v315_v14 = vadd.f32 %v427_v8, %v314_v12  ;;  %v466_v15 = vpop.f32.mrb[3].mxu0 }
  0xf7   : > { %v442_v16 = vpack.c.bf16 %v318_v13, %v318_v13  ;;  %v319_v17 = vmax.f32 %v315_v14, 0.0 }
  0xf9   : > { %329 = vst.msk [vmem:[%s208_s9] sm:$0xf] %vm328_vm2, %v442_v16  ;;  %v443_v18 = vpack.c.bf16 %v319_v17, %v319_v17 }
  0xfb   : > { %330 = vst.msk [vmem:[%s208_s9 + $0x4] sm:$0xf] %vm328_vm2, %v443_v18 }
  0xfc PF: > { %s13_s14 = sadd.s32 1, %s522_s14   ;;  %s604_s12 = smov %s518_s13 }
  0xfd   : > { %p10_p5 = scmp.ge.s32.totalorder %s13_s14, 4   ;;  %s605_s13 = smov %s607_s15 }
  0xff   :  { %12 = sbr.rel (!%p10_p5) target bundleno = 2 (0x2), region = 62 }

// kernel: custom-call.10
= control target key start
LH: loop header
LB: loop body
LE: loop exit
PB: predicated region body
PF: predicated region fallthrough
CT: control target
= control target key end

     0   :  { %s6_s0 = inlined_call_operand.vmem [shape: f32[7,2,9], index: 0, kind: output, shape index: {}]  }

// kernel: rnnt_forward.3
= control target key start
LH: loop header
LB: loop body
LE: loop exit
PB: predicated region body
PF: predicated region fallthrough
CT: control target
= control target key end

     0   :  { %s455_s12 = smov 0   ;;  %s457_s13 = smov 0   ;;  %s500_s0 = inlined_call_operand.vmem [shape: bf16[2,8,48], index: 0, kind: input, shape index: {}]   ;;  %s501_s1 = inlined_call_operand.vmem [shape: bf16[48,32], index: 1, kind: input, shape index: {}]   ;;  %s502_s2 = inlined_call_operand.vmem [shape: f32[1,32], index: 2, kind: input, shape index: {}]   ;;  %s503_s3 = inlined_call_operand.vmem [shape: bf16[2,8,32], index: 3, kind: output, shape index: {}]  }
   0x1   :  { %s459_s14 = smov 0  }
   0x2 LB: > { %s25_s15 = sadd.s32 1, %s427_s13  ;;  %p356_p0 = scmp.ge.s32.totalorder %s431_s14, 1  ;;  %s431_s14 = sphi %s459_s14, %s13_s14   ;;  %s427_s13 = sphi %s457_s13, %s505_s13   ;;  %s423_s12 = sphi %s455_s12, %s504_s12  }
   0x3   : > { %p27_p1 = scmp.ge.s32.totalorder %s25_s15, 2  ;;  %p155_p2 = scmp.lt.s32.totalorder %s431_s14, 3 }
   0x5   : > { %s507_s15 = smov (%p27_p1, %s25_s15), 0  ;;  %p156_p3 = pnand %p356_p0, %p155_p2 }
   0x6   : > { %v406_v0 = vld [vmem:[%s501_s1] sm:$0xff] (!%p156_p3)   ;;  %v433_v1 = vmov (!%p156_p3), 0.0   ;;  %v407_v2 = vld [vmem:[%s501_s1 + $0x8] sm:$0xff] (!%p156_p3)   ;;  %vm434_vm0 = vmmov (!%p156_p3), 0   ;;  %p183_p4 = scmp.lt.s32.totalorder (!%p156_p3), %s423_s12, 1  ;;  %v408_v3 = vld [vmem:[%s501_s1 + $0x10] sm:$0xff] (!%p156_p3)  }
   0x7   : > { %159 = sbr.rel (%p156_p3) target bundleno = 238 (0xee), region = 32  ;;  %370 = vmatprep.subr.bf16.mxu0 (!%p156_p3), %v433_v1  ;;  %376 = vmatprep.mubr.msk.bf16.mxu0 (!%p156_p3), %vm434_vm0, %v433_v1  ;;  %vm230_vm1 = vcmask (!%p156_p3), 392192   ;;  %v359_v5 = vld [vmem:[%s502_s2] ss:$0 sm:$0xff] (!%p156_p3)  ;;  %vm276_vm2 = vcmask (!%p156_p3), 257024  }
   0x8   : > { %371 = vmatpush3.bf16.msra.mxu0 (!%p156_p3), %v406_v0 }
   0x9   : > { %372 = vmatprep.subr.bf16.mxu0 (!%p156_p3), %v433_v1 }
   0xc   : > { %373 = vmatpush3.bf16.msra.mxu0 (!%p156_p3), %v407_v2 }
   0xd   : > { %374 = vmatprep.subr.bf16.mxu0 (!%p156_p3), %v433_v1 }
   0xe   : > { %s509_s12 = smov (!%p183_p4, %s423_s12), 1 }
   0xf   : > { %s357_s22 = sshll.u32 %s509_s12, 2 }
  0x10   : > { %s189_s25 = scalar_lea.vmem %s500_s0, %s357_s22  ;;  %375 = vmatpush3.bf16.msra.mxu0 %v408_v3  ;;  %s196_s30 = scalar_lea.vmem %s503_s3, %s357_s22 }
  0x11   : > { %v198_v4 = vld [vmem:[%s189_s25] sm:$0xf] }
  0x13   : > { %377 = vmatmul.mubr.msk.bf16.vlgmr.msra.gmra.mrb[0].mxu0 %vm230_vm1, %v198_v4 }
  0xe6   : > { %v268_v6 = vpop.f32.mrb[0].mxu0 }
  0xe7   : > { %v269_v7 = vadd.f32 %v359_v5, %v268_v6  ;;  %v378_v8 = vpop.f32.mrb[1].mxu0 }
  0xe8   : > { %v271_v9 = vpop.f32.mrb[2].mxu0 }
  0xe9   : > { %v274_v10 = vmax.f32 %v269_v7, 0.0  ;;  %v379_v11 = vpop.f32.mrb[3].mxu0 }
  0xeb   : > { %v275_v12 = vpack.c.bf16 %v274_v10, %v274_v10 }
  0xed   : > { %277 = vst.msk [vmem:[%s196_s30] sm:$0xf] %vm276_vm2, %v275_v12 }
  0xee PF: > { %s13_s14 = sadd.s32 1, %s431_s14   ;;  %s504_s12 = smov %s427_s13 }
  0xef   : > { %p10_p5 = scmp.ge.s32.totalorder %s13_s14, 4   ;;  %s505_s13 = smov %s507_s15 }
  0xf1   :  { %12 = sbr.rel (!%p10_p5) target bundleno = 2 (0x2), region = 62 }

// kernel: rnnt_forward.5
= control target key start
LH: loop header
LB: loop body
LE: loop exit
PB: predicated region body
PF: predicated region fallthrough
CT: control target
= control target key end

     0   :  { %s2160_s13 = smov 0   ;;  %s2162_s14 = smov 0   ;;  %s2668_s0 = inlined_call_operand.vmem [shape: bf16[2,8,32], index: 0, kind: input, shape index: {}]   ;;  %s2669_s1 = inlined_call_operand.vmem [shape: bf16[2,16,32], index: 1, kind: input, shape index: {}]   ;;  %s2670_s2 = inlined_call_operand.vmem [shape: s32[2,16,1], index: 2, kind: input, shape index: {}]   ;;  %s2671_s3 = inlined_call_operand.vmem [shape: bf16[32,32], index: 3, kind: input, shape index: {}]   ;;  %s2672_s4 = inlined_call_operand.vmem [shape: f32[1,32], index: 4, kind: input, shape index: {}]   ;;  %s2673_s5 = inlined_call_operand.vmem [shape: bf16[32,32], index: 5, kind: input, shape index: {}]   ;;  %s2674_s6 = inlined_call_operand.vmem [shape: f32[1,32], index: 6, kind: input, shape index: {}]   ;;  %s2675_s7 = inlined_call_operand.vmem [shape: bf16[32,16], index: 7, kind: input, shape index: {}]   ;;  %s2676_s8 = inlined_call_operand.vmem [shape: f32[1,16], index: 8, kind: input, shape index: {}]   ;;  %s2677_s9 = inlined_call_operand.vmem [shape: f32[2,16,8], index: 9, kind: output, shape index: {0}]   ;;  %s2678_s10 = inlined_call_operand.vmem [shape: f32[2,16,8], index: 10, kind: output, shape index: {1}]  }
   0x1   :  { %s2164_s15 = smov 0  }
   0x2 LB: > { %s40_s16 = sadd.s32 1, %s2094_s14  ;;  %p1848_p0 = scmp.ge.s32.totalorder %s2098_s15, 1  ;;  %s2098_s15 = sphi %s2164_s15, %s21_s15   ;;  %s2094_s14 = sphi %s2162_s14, %s2684_s14   ;;  %s2090_s13 = sphi %s2160_s13, %s2683_s13  }
   0x3   : > { %p42_p1 = scmp.ge.s32.totalorder %s40_s16, 2  ;;  %p380_p2 = scmp.lt.s32.totalorder %s2098_s15, 3 }
   0x5   : > { %s2686_s16 = smov (%p42_p1, %s40_s16), 0  ;;  %p381_p3 = pnand %p1848_p0, %p380_p2 }
   0x6   : > { %v1973_v0 = vld [vmem:[%s2673_s5] sm:$0xff] (!%p381_p3)   ;;  %v2100_v1 = vmov (!%p381_p3), 0.0   ;;  %v1975_v3 = vld [vmem:[%s2673_s5 + $0x8] sm:$0xff] (!%p381_p3)   ;;  %vm2101_vm0 = vmmov (!%p381_p3), 0   ;;  %p457_p4 = scmp.lt.s32.totalorder (!%p381_p3), %s2090_s13, 1  ;;  %vm545_vm1 = vcmask (!%p381_p3), 261120   ;;  %v667_v11 = vlaneseq (!%p381_p3) }
   0x7   : > { %384 = sbr.rel (%p381_p3) target bundleno = 1283 (0x503), region = 56  ;;  %1900 = vmatprep.subr.bf16.mxu0 (!%p381_p3), %v2100_v1  ;;  %1908 = vmatprep.subr.bf16.mxu1 (!%p381_p3), %v2100_v1  ;;  %v1974_v2 = vld [vmem:[%s2671_s3] sm:$0xff] (!%p381_p3)   ;;  %v1976_v4 = vld [vmem:[%s2671_s3 + $0x8] sm:$0xff] (!%p381_p3)   ;;  %v2102_v9 = vmov (!%p381_p3), 1966171168   ;;  %vm938_vm2 = vcmask (!%p381_p3), 130048  }
   0x8   : > { %1901 = vmatpush3.bf16.msra.mxu0 (!%p381_p3), %v1973_v0  ;;  %1904 = vmatprep.mubr.msk.bf16.mxu0 (!%p381_p3), %vm2101_vm0, %v2100_v1  ;;  %v1978_v7 = vld [vmem:[%s2675_s7] sm:$0xff] (!%p381_p3)   ;;  %v1979_v8 = vld [vmem:[%s2675_s7 + $0x8] sm:$0xff] (!%p381_p3)   ;;  %v665_v10 = vunpack.c.l.s4 (!%p381_p3), %v2102_v9  ;;  %v2209_v13 = vshrl.u32 (!%p381_p3), %v667_v11, 7  ;;  %vm1406_vm5 = vcmask (!%p381_p3), 130112   ;;  %vm1471_vm6 = vcmask (!%p381_p3), 1041409  }
   0x9   : > { %1909 = vmatpush3.bf16.msra.mxu1 (!%p381_p3), %v1974_v2  ;;  %1902 = vmatprep.subr.bf16.mxu0 (!%p381_p3), %v2100_v1  ;;  %v1858_v14 = vld [vmem:[%s2674_s6] ss:$0 sm:$0xff] (!%p381_p3)  ;;  %vm1473_vm7 = vcmask (!%p381_p3), 1042434   ;;  %vm1475_vm8 = vcmask (!%p381_p3), 1043459   ;;  %vm1477_vm9 = vcmask (!%p381_p3), 1044484   ;;  %vm1479_vm10 = vcmask (!%p381_p3), 1045509  }
   0xa   : > { %1910 = vmatprep.subr.bf16.mxu1 (!%p381_p3), %v2100_v1  ;;  %1912 = vmatprep.mubr.msk.bf16.mxu1 (!%p381_p3), %vm2101_vm0, %v2100_v1  ;;  %v666_v12 = vunpack.c.0.s8 (!%p381_p3), %v665_v10  ;;  %v1863_v15 = vld [vmem:[%s2672_s4] ss:$0 sm:$0xff] (!%p381_p3)  ;;  %v714_v30 = vsub.s32 (!%p381_p3), 0, %v2209_v13  ;;  %vm1481_vm11 = vcmask (!%p381_p3), 1046534   ;;  %vm1483_vm12 = vcmask (!%p381_p3), 1047559  }
   0xb   : > { %vm1518_vm13 = vcmask (!%p381_p3), 64512  }
   0xc   : > { %1903 = vmatpush3.bf16.msra.mxu0 (!%p381_p3), %v1975_v3  ;;  %v669_v16 = vsub.s32 (!%p381_p3), %v666_v12, %v2209_v13 }
   0xd   : > { %1911 = vmatpush3.bf16.msra.mxu1 (!%p381_p3), %v1976_v4  ;;  %1916 = vmatprep.subr.bf16.mxu0 (!%p381_p3), %v1978_v7 }
   0xe   : > { %s2688_s13 = smov (!%p457_p4, %s2090_s13), 1  ;;  %1936 = vmatprep.subr.bf16.mxu1 %v1978_v7 }
   0xf   : > { %s1880_s25 = sshll.u32 %s2688_s13, 3  ;;  %s1849_s26 = sshll.u32 %s2688_s13, 2 }
  0x10   : > { %s472_s29 = scalar_lea.vmem %s2669_s1, %s1880_s25  ;;  %s463_s12 = scalar_lea.vmem %s2668_s0, %s1849_s26 }
  0x11   : > { %v1977_v5 = vld [vmem:[%s472_s29] sm:$0xff]   ;;  %s2354_s27 = sshll.u32 %s2688_s13, 4 }
  0x12   : > { %v592_v6 = vld [vmem:[%s463_s12] sm:$0xf]  ;;  %1905 = vmatmul.mubr.msk.bf16.vlgmr.msra.gmra.mrb[0].mxu0 %vm545_vm1, %v1977_v5  ;;  %s482_s30 = scalar_lea.vmem %s2670_s2, %s2354_s27  ;;  %s508_s12 = scalar_lea.vmem %s2678_s10, %s2354_s27 }
  0x13   : > { %1913 = vmatmul.mubr.msk.bf16.vlgmr.msra.gmra.mrb[0].mxu1 %vm545_vm1, %v592_v6  ;;  %1917 = vmatpush3.bf16.msra.mxu0 %v1978_v7  ;;  %s495_s19 = scalar_lea.vmem %s2677_s9, %s2354_s27 }
  0x14   : > { %1938 = vmatpush3.bf16.msra.mxu1 %v1978_v7  ;;  %1918 = vmatprep.subr.bf16.mxu0 %v1979_v8 }
  0x15   : > { %1937 = vmatprep.subr.bf16.mxu1 %v1979_v8 }
  0x17   : > { %1919 = vmatpush3.bf16.msra.mxu0 %v1979_v8 }
  0x18   : > { %1939 = vmatpush3.bf16.msra.mxu1 %v1979_v8 }
  0xe5   : > { %v583_v17 = vpop.f32.mrb[0].mxu0 }
  0xe6   : > { %v654_v18 = vpop.f32.mrb[0].mxu1  ;;  %v584_v19 = vadd.f32 %v1858_v14, %v583_v17  ;;  %v1906_v21 = vpop.f32.mrb[1].mxu0 }
  0xe7   : > { %v655_v20 = vadd.f32 %v1863_v15, %v654_v18  ;;  %v1914_v22 = vpop.f32.mrb[1].mxu1  ;;  %v586_v23 = vpop.f32.mrb[2].mxu0 }
  0xe8   : > { %v657_v24 = vpop.f32.mrb[2].mxu1  ;;  %590 = vst.msk [vmem:[#allocation2] sm:$0xff] %vm545_vm1, %v584_v19  ;;  %v587_v27 = vadd.f32 %v1858_v14, %v586_v23  ;;  %v1907_v28 = vpop.f32.mrb[3].mxu0 }
  0xe9   : > { %v663_v25 = vcombine.high %v655_v20, %v655_v20  ;;  %v670_v26 = vrot.slane %v655_v20, %v669_v16  ;;  %v1915_v29 = vpop.f32.mrb[3].mxu1 }
  0xea   : > { %591 = vst.msk [vmem:[#allocation2 + $0x8] sm:$0xff] %vm545_vm1, %v587_v27 }
  0xeb   : > { %v677_v31 = vrot.slane %v663_v25, %v669_v16  ;;  %v678_v32 = vcombine.high %v670_v26, %v670_v26  ;;  %v686_v33 = vrot.slane %v670_v26, %v669_v16 }
  0xed   : > { %v679_v34 = vcombine.high %v677_v31, %v677_v31  ;;  %v693_v35 = vrot.slane %v677_v31, %v669_v16  ;;  %v700_v36 = vrot.slane %v678_v32, %v669_v16  ;;  %v708_v37 = vcombine.high %v686_v33, %v686_v33 }
  0xee   : > { %v715_v38 = vrot.slane %v686_v33, %v714_v30 }
  0xef   : > { %v707_v39 = vrot.slane %v679_v34, %v669_v16  ;;  %v709_v40 = vcombine.high %v693_v35, %v693_v35  ;;  %v710_v41 = vcombine.high %v700_v36, %v700_v36  ;;  %v719_v42 = vrot.slane %v700_v36, %v714_v30  ;;  %v660_v43 = vld [vmem:[#allocation2] sm:$0xff] }
  0xf0   : > { %v723_v44 = vrot.slane %v708_v37, %v714_v30  ;;  %v731_v45 = vrot.slane %v693_v35, %v714_v30  ;;  %v752_v50 = vadd.f32 %v715_v38, %v660_v43 }
  0xf1   : > { %v711_v46 = vcombine.high %v707_v39, %v707_v39  ;;  %v727_v47 = vrot.slane %v710_v41, %v714_v30  ;;  %v735_v48 = vrot.slane %v707_v39, %v714_v30  ;;  %v739_v49 = vrot.slane %v709_v40, %v714_v30  ;;  %v661_v52 = vld [vmem:[#allocation2 + $0x8] sm:$0xff] }
  0xf2   : > { %v754_v51 = vadd.f32 %v719_v42, %v660_v43  ;;  %v760_v53 = vadd.f32 %v731_v45, %v660_v43  ;;  %v756_v54 = vadd.f32 %v723_v44, %v660_v43  ;;  %v753_v56 = vadd.f32 %v715_v38, %v661_v52 }
  0xf3   : > { %v762_v55 = vadd.f32 %v735_v48, %v660_v43  ;;  %v761_v57 = vadd.f32 %v731_v45, %v661_v52  ;;  %v755_v58 = vadd.f32 %v719_v42, %v661_v52  ;;  %v768_v59 = vmax.f32 %v752_v50, 0.0 }
  0xf4   : > { %v770_v60 = vmax.f32 %v754_v51, 0.0  ;;  %v776_v61 = vmax.f32 %v760_v53, 0.0  ;;  %v763_v62 = vadd.f32 %v735_v48, %v661_v52  ;;  %v769_v0 = vmax.f32 %v753_v56, 0.0 }
  0xf5   : > { %v778_v63 = vmax.f32 %v762_v55, 0.0  ;;  %v777_v1 = vmax.f32 %v761_v57, 0.0  ;;  %v771_v2 = vmax.f32 %v755_v58, 0.0  ;;  %v757_v4 = vadd.f32 %v723_v44, %v661_v52 }
  0xf6   : > { %v779_v3 = vmax.f32 %v763_v62, 0.0  ;;  %v772_v5 = vmax.f32 %v756_v54, 0.0  ;;  %v764_v6 = vadd.f32 %v739_v49, %v660_v43  ;;  %v784_v7 = vpack.c.bf16 %v769_v0, %v768_v59 }
  0xf7   : > { %v788_v8 = vpack.c.bf16 %v777_v1, %v776_v61  ;;  %v785_v9 = vpack.c.bf16 %v771_v2, %v770_v60  ;;  %v765_v10 = vadd.f32 %v739_v49, %v661_v52  ;;  %v773_v14 = vmax.f32 %v757_v4, 0.0 }
  0xf8   : > { %v789_v12 = vpack.c.bf16 %v779_v3, %v778_v63  ;;  %v780_v15 = vmax.f32 %v764_v6, 0.0  ;;  %v758_v16 = vadd.f32 %v727_v47, %v660_v43  ;;  %1920 = vmatprep.mubr.msk.bf16.mxu0 %vm545_vm1, %v784_v7  ;;  %v759_v18 = vadd.f32 %v727_v47, %v661_v52 }
  0xf9   : > { %1928 = vmatprep.mubr.msk.bf16.mxu1 %vm545_vm1, %v788_v8  ;;  %v781_v17 = vmax.f32 %v765_v10, 0.0  ;;  %v743_v19 = vrot.slane %v711_v46, %v714_v30  ;;  %1921 = vmatmul.mubr.msk.bf16.vlgmr.msra.gmra.mrb[4].mxu0 %vm545_vm1, %v785_v9  ;;  %v786_v20 = vpack.c.bf16 %v773_v14, %v772_v5  ;;  %v1867_v30 = vld [vmem:[%s2676_s8] ss:$0 sm:$0xff] }
  0xfa   : > { %1929 = vmatmul.mubr.msk.bf16.vlgmr.msra.gmra.mrb[4].mxu1 %vm545_vm1, %v789_v12  ;;  %v774_v24 = vmax.f32 %v758_v16, 0.0  ;;  %v775_v25 = vmax.f32 %v759_v18, 0.0 }
  0xfb   : > { %v790_v21 = vpack.c.bf16 %v781_v17, %v780_v15  ;;  %v766_v22 = vadd.f32 %v743_v19, %v660_v43  ;;  %v767_v23 = vadd.f32 %v743_v19, %v661_v52  ;;  %1924 = vmatprep.mubr.msk.bf16.mxu0 %vm545_vm1, %v786_v20  ;;  %v2103_v17 = vmov 0  }
  0xfc   : > { %v787_v28 = vpack.c.bf16 %v775_v25, %v774_v24  ;;  %1970 = vset.pattern.permute.xlu1 %v2103_v17  ;;  %1969 = vset.pattern.permute.xlu0 %v2103_v17 }
  0xfd   : > { %1932 = vmatprep.mubr.msk.bf16.mxu1 %vm545_vm1, %v790_v21  ;;  %v782_v26 = vmax.f32 %v766_v22, 0.0  ;;  %v783_v27 = vmax.f32 %v767_v23, 0.0 }
  0xff   : > { %v791_v29 = vpack.c.bf16 %v783_v27, %v782_v26 }
 0x101   : > { %1925 = vmatmul.mubr.msk.bf16.gmra.mrb[8].mxu0 %vm545_vm1, %v787_v28 }
 0x102   : > { %1933 = vmatmul.mubr.msk.bf16.gmra.mrb[8].mxu1 %vm545_vm1, %v791_v29 }
 0x1cc   : > { %v1922_v31 = vpop.f32.mrb[4].mxu0 }
 0x1cd   : > { %v1930_v32 = vpop.f32.mrb[4].mxu1  ;;  %v2232_v33 = vadd.f32 %v1922_v31, %v1867_v30  ;;  %v875_v35 = vpop.f32.mrb[5].mxu0 }
 0x1ce   : > { %v2234_v34 = vadd.f32 %v1930_v32, %v1867_v30  ;;  %v907_v36 = vpop.f32.mrb[5].mxu1  ;;  %v1923_v37 = vpop.f32.mrb[6].mxu0  ;;  %v2236_v39 = vadd.f32 %v1867_v30, %v875_v35 }
 0x1cf   : > { %v1931_v38 = vpop.f32.mrb[6].mxu1  ;;  %v2238_v40 = vadd.f32 %v1923_v37, %v1867_v30  ;;  %v878_v41 = vpop.f32.mrb[7].mxu0  ;;  %v945_v43 = vsel %vm938_vm2, %v2232_v33, -inf  ;;  %v2244_v45 = vadd.f32 %v1867_v30, %v907_v36 }
 0x1d0   : > { %v910_v42 = vpop.f32.mrb[7].mxu1  ;;  %v969_v44 = vsel %vm938_vm2, %v2234_v34, -inf  ;;  %946 = vmax.xlane.f32.xlu1 %v945_v43  ;;  %v2246_v46 = vadd.f32 %v1931_v38, %v1867_v30  ;;  %v939_v48 = vsel %vm938_vm2, %v2236_v39, -inf  ;;  %v2252_v55 = vadd.f32 %v1867_v30, %v878_v41 }
 0x1d1   : > { %970 = vmax.xlane.f32.xlu0 %v969_v44  ;;  %v948_v47 = vsel %vm938_vm2, %v2238_v40, -inf  ;;  %v2254_v56 = vadd.f32 %v1867_v30, %v910_v42  ;;  %v963_v60 = vsel %vm938_vm2, %v2244_v45, -inf }
 0x1d2   : > { %v972_v59 = vsel %vm938_vm2, %v2246_v46, -inf  ;;  %v942_v0 = vsel %vm938_vm2, %v2252_v55, -inf }
 0x1d3   : > { %v966_v63 = vsel %vm938_vm2, %v2254_v56, -inf }
 0x1d4   : > { %949 = vmax.xlane.f32.xlu1 %v948_v47  ;;  %v1926_v49 = vpop.f32.mrb[8].mxu0 }
 0x1d5   : > { %940 = vmax.xlane.f32.xlu0 %v939_v48  ;;  %v1934_v50 = vpop.f32.mrb[8].mxu1  ;;  %v891_v51 = vpop.f32.mrb[9].mxu0  ;;  %v2260_v61 = vadd.f32 %v1926_v49, %v1867_v30 }
 0x1d6   : > { %v923_v52 = vpop.f32.mrb[9].mxu1  ;;  %v1927_v53 = vpop.f32.mrb[10].mxu0  ;;  %v2268_v1 = vadd.f32 %v1867_v30, %v891_v51  ;;  %v2284_v9 = vadd.f32 %v1934_v50, %v1867_v30 }
 0x1d7   : > { %v1935_v54 = vpop.f32.mrb[10].mxu1  ;;  %v894_v57 = vpop.f32.mrb[11].mxu0  ;;  %v2262_v62 = vadd.f32 %v1927_v53, %v1867_v30  ;;  %v957_v4 = vsel %vm938_vm2, %v2260_v61, -inf  ;;  %v2276_v5 = vadd.f32 %v1867_v30, %v923_v52 }
 0x1d8   : > { %v926_v58 = vpop.f32.mrb[11].mxu1  ;;  %973 = vmax.xlane.f32.xlu1 %v972_v59  ;;  %v2270_v2 = vadd.f32 %v1935_v54, %v1867_v30  ;;  %v2278_v6 = vadd.f32 %v1867_v30, %v894_v57  ;;  %v951_v8 = vsel %vm938_vm2, %v2268_v1, -inf  ;;  %v981_v16 = vsel %vm938_vm2, %v2284_v9, -inf }
 0x1d9   : > { %964 = vmax.xlane.f32.xlu0 %v963_v60  ;;  %v960_v3 = vsel %vm938_vm2, %v2262_v62, -inf  ;;  %v2286_v10 = vadd.f32 %v1867_v30, %v926_v58  ;;  %v975_v14 = vsel %vm938_vm2, %v2276_v5, -inf }
 0x1da   : > { %v984_v7 = vsel %vm938_vm2, %v2270_v2, -inf  ;;  %v954_v12 = vsel %vm938_vm2, %v2278_v6, -inf }
 0x1db   : > { %v978_v15 = vsel %vm938_vm2, %v2286_v10, -inf }
 0x1dc   : > { %967 = vmax.xlane.f32.xlu1 %v966_v63 }
 0x1dd   : > { %943 = vmax.xlane.f32.xlu0 %v942_v0 }
 0x1e0   : > { %961 = vmax.xlane.f32.xlu1 %v960_v3 }
 0x1e1   : > { %958 = vmax.xlane.f32.xlu0 %v957_v4 }
 0x1e4   : > { %985 = vmax.xlane.f32.xlu1 %v984_v7 }
 0x1e5   : > { %952 = vmax.xlane.f32.xlu0 %v951_v8 }
 0x1e8   : > { %955 = vmax.xlane.f32.xlu1 %v954_v12 }
 0x1e9   : > { %976 = vmax.xlane.f32.xlu0 %v975_v14 }
 0x1ec   : > { %979 = vmax.xlane.f32.xlu1 %v978_v15 }
 0x1ed   : > { %982 = vmax.xlane.f32.xlu0 %v981_v16 }
 0x25d   : > { %v2296_v18 = vpop.xlane.xlu1 %946 }
 0x25e   : > { %v2298_v19 = vpop.xlane.xlu0 %970  ;;  %v1053_v20 = vsub.f32 %v2232_v33, %v2296_v18 }
 0x25f   : > { %v1061_v21 = vsub.f32 %v2234_v34, %v2298_v19 }
 0x260   : > { %v1071_v22 = vmul.f32 1.442695, %v1053_v20 }
 0x261   : > { %v2304_v23 = vpop.xlane.xlu1 %949  ;;  %v1087_v25 = vmul.f32 1.442695, %v1061_v21 }
 0x262   : > { %v2306_v24 = vpop.xlane.xlu0 %940  ;;  %v1054_v26 = vsub.f32 %v2238_v40, %v2304_v23  ;;  %1980 = vpow2.f32 %v1071_v22 }
 0x263   : > { %v1051_v27 = vsub.f32 %v2236_v39, %v2306_v24  ;;  %1982 = vpow2.f32 %v1087_v25 }
 0x264   : > { %v1073_v28 = vmul.f32 1.442695, %v1054_v26 }
 0x265   : > { %v2312_v29 = vpop.xlane.xlu1 %973  ;;  %v1067_v31 = vmul.f32 1.442695, %v1051_v27 }
 0x266   : > { %v2314_v30 = vpop.xlane.xlu0 %964  ;;  %v1062_v32 = vsub.f32 %v2246_v46, %v2312_v29  ;;  %1984 = vpow2.f32 %v1073_v28 }
 0x267   : > { %v1059_v35 = vsub.f32 %v2244_v45, %v2314_v30  ;;  %1986 = vpow2.f32 %v1067_v31 }
 0x268   : > { %v1089_v36 = vmul.f32 1.442695, %v1062_v32 }
 0x269   : > { %v2320_v37 = vpop.xlane.xlu1 %967  ;;  %v1083_v41 = vmul.f32 1.442695, %v1059_v35 }
 0x26a   : > { %v2322_v38 = vpop.xlane.xlu0 %943  ;;  %1988 = vpow2.f32 %v1089_v36  ;;  %v1060_v43 = vsub.f32 %v2254_v56, %v2320_v37 }
 0x26b   : > { %v1052_v42 = vsub.f32 %v2252_v55, %v2322_v38  ;;  %1990 = vpow2.f32 %v1083_v41 }
 0x26c   : > { %v1981_v44 = vpop.eup %1980  ;;  %v1085_v52 = vmul.f32 1.442695, %v1060_v43 }
 0x26d   : > { %v1069_v47 = vmul.f32 1.442695, %v1052_v42  ;;  %v1105_v50 = vsel %vm938_vm2, %v1981_v44, 0.0  ;;  %v1983_v51 = vpop.eup %1982  ;;  %v793_v42 = vld [vmem:[%s482_s30 + $0x8] sm:$0xff] }
 0x26e   : > { %v2328_v48 = vpop.xlane.xlu0 %958  ;;  %1106 = vadd.xlane.f32.xlu0 %v1105_v50  ;;  %v1129_v59 = vsel %vm938_vm2, %v1983_v51, 0.0  ;;  %v2363_v50 = vpop.xlane.xlu1 %961 }
 0x26f   : > { %v1057_v49 = vsub.f32 %v2260_v61, %v2328_v48  ;;  %1992 = vpow2.f32 %v1069_v47  ;;  %v792_v47 = vld [vmem:[%s482_s30] sm:$0xff] }
 0x270   : > { %v1985_v53 = vpop.eup %1984  ;;  %1994 = vpow2.f32 %v1085_v52 }
 0x271   : > { %v1079_v54 = vmul.f32 1.442695, %v1057_v49  ;;  %v1108_v58 = vsel %vm938_vm2, %v1985_v53, 0.0  ;;  %v1987_v60 = vpop.eup %1986  ;;  %v2104_v49 = vmov 15  }
 0x272   : > { %v2333_v57 = vpop.xlane.xlu0 %952  ;;  %1109 = vadd.xlane.f32.xlu1 %v1108_v58  ;;  %1130 = vadd.xlane.f32.xlu0 %v1129_v59  ;;  %v1099_v4 = vsel %vm938_vm2, %v1987_v60, 0.0  ;;  %v2365_v51 = vpop.xlane.xlu1 %985 }
 0x273   : > { %1996 = vpow2.f32 %v1079_v54  ;;  %v1055_v14 = vsub.f32 %v2268_v1, %v2333_v57 }
 0x274   : > { %v1989_v63 = vpop.eup %1988 }
 0x275   : > { %v1132_v3 = vsel %vm938_vm2, %v1989_v63, 0.0  ;;  %v1991_v7 = vpop.eup %1990  ;;  %v1075_v25 = vmul.f32 1.442695, %v1055_v14 }
 0x276   : > { %v2337_v0 = vpop.xlane.xlu0 %976  ;;  %1133 = vadd.xlane.f32.xlu1 %v1132_v3  ;;  %1100 = vadd.xlane.f32.xlu0 %v1099_v4  ;;  %v1123_v16 = vsel %vm938_vm2, %v1991_v7, 0.0  ;;  %v2367_v52 = vpop.xlane.xlu1 %955 }
 0x277   : > { %v1063_v26 = vsub.f32 %v2276_v5, %v2337_v0 }
 0x279   : > { %v1993_v12 = vpop.eup %1992  ;;  %v1091_v31 = vmul.f32 1.442695, %v1063_v26  ;;  %v998_v26 = vsub.f32 -inf, %v2312_v29 }
 0x27a   : > { %v2341_v8 = vpop.xlane.xlu0 %982  ;;  %1124 = vadd.xlane.f32.xlu0 %v1123_v16  ;;  %v1102_v20 = vsel %vm938_vm2, %v1993_v12, 0.0  ;;  %v1995_v21 = vpop.eup %1994  ;;  %v2384_v12 = vand.u32 127, %v667_v11  ;;  %v987_v11 = vsub.f32 -inf, %v2306_v24 }
 0x27b   : > { %v1065_v15 = vsub.f32 %v2284_v9, %v2341_v8  ;;  %1103 = vadd.xlane.f32.xlu1 %v1102_v20  ;;  %v1126_v28 = vsel %vm938_vm2, %v1995_v21, 0.0  ;;  %v2369_v53 = vpop.xlane.xlu1 %979 }
 0x27d   : > { %v1095_v17 = vmul.f32 1.442695, %v1065_v15  ;;  %v1997_v22 = vpop.eup %1996 }
 0x27e   : > { %v1117_v27 = vsel %vm938_vm2, %v1997_v22, 0.0 }
 0x27f   : > { %1998 = vpow2.f32 %v1095_v17  ;;  %1118 = vadd.xlane.f32.xlu0 %v1117_v27  ;;  %1127 = vadd.xlane.f32.xlu1 %v1126_v28  ;;  %v1025_v27 = vmul.f32 1.442695, %v998_v26  ;;  %v996_v28 = vsub.f32 -inf, %v2320_v37 }
 0x280   : > { %2000 = vpow2.f32 %v1075_v25  ;;  %v1003_v25 = vmul.f32 1.442695, %v987_v11 }
 0x281   : > { %2002 = vpow2.f32 %v1091_v31 }
 0x282   : > { %2004 = vpow2.f32 %v1003_v25 }
 0x283   : > { %2006 = vpow2.f32 %v1025_v27 }
 0x289   : > { %v1999_v32 = vpop.eup %1998 }
 0x28a   : > { %v1141_v35 = vsel %vm938_vm2, %v1999_v32, 0.0  ;;  %v2001_v36 = vpop.eup %2000  ;;  %v1021_v32 = vmul.f32 1.442695, %v996_v28  ;;  %v1058_v28 = vsub.f32 %v2262_v62, %v2363_v50 }
 0x28b   : > { %1142 = vadd.xlane.f32.xlu0 %v1141_v35  ;;  %v1111_v41 = vsel %vm938_vm2, %v2001_v36, 0.0  ;;  %v2003_v43 = vpop.eup %2002 }
 0x28c   : > { %v1135_v44 = vsel %vm938_vm2, %v2003_v43, 0.0  ;;  %2008 = vpow2.f32 %v1021_v32 }
 0x28f   : > { %1112 = vadd.xlane.f32.xlu0 %v1111_v41 }
 0x290   : > { %1169 = vperm.xlu1 %1970, %v793_v42  }
 0x293   : > { %1136 = vadd.xlane.f32.xlu0 %v1135_v44 }
 0x294   : > { %1971 = vset.pattern.permute.xlu1 %v2104_v49 }
 0x2a9   : > { %1166 = vperm.xlu0 %1969, %v792_v47  }
 0x2ad   : > { %1972 = vset.pattern.permute.xlu0 %v2104_v49 }
 0x2fb   : > { %v2371_v54 = vpop.xlane.xlu0 %1106 }
 0x2ff   : > { %v2373_v58 = vpop.xlane.xlu1 %1109  ;;  %v2375_v59 = vpop.xlane.xlu0 %1130 }
 0x303   : > { %v1134_v60 = vpop.xlane.xlu1 %1133  ;;  %v1101_v63 = vpop.xlane.xlu0 %1100 }
 0x307   : > { %v2381_v7 = vpop.xlane.xlu0 %1124 }
 0x308   : > { %v2377_v3 = vpop.xlane.xlu1 %1103 }
 0x30c   : > { %v2379_v4 = vpop.xlane.xlu1 %1127  ;;  %v2394_v17 = vpop.xlane.xlu0 %1118 }
 0x310   : > { %v1170_v14 = vpop.permute.xlu1 %1169 }
 0x311   : > { %vm2387_vm3 = vcmp.eq.s32.totalorder %v2384_v12, %v1170_v14  ;;  %v2005_v14 = vpop.eup %2004 }
 0x312   : > { %v1174_v16 = vsel %vm2387_vm3, %v2252_v55, 0.0  ;;  %v1176_v25 = vsel %vm2387_vm3, %v2238_v40, 0.0  ;;  %v1035_v26 = vmul.f32 0.0, %v2005_v14  ;;  %v2007_v27 = vpop.eup %2006 }
 0x313   : > { %v1192_v20 = vsel %vm938_vm2, %v1174_v16, 0.0 }
 0x314   : > { %1193 = vadd.xlane.f32.xlu0 %v1192_v20  ;;  %v1147_v32 = vadd.f32 %v1101_v63, %v1035_v26  ;;  %v1066_v63 = vsub.f32 %v2270_v2, %v2365_v51 }
 0x316   : > { %2010 = vlog2.f32 %v1147_v32  ;;  %v1097_v26 = vmul.f32 1.442695, %v1066_v63 }
 0x318   : > { %v2397_v21 = vpop.xlane.xlu0 %1142 }
 0x31c   : > { %v2400_v22 = vpop.xlane.xlu0 %1112 }
 0x320   : > { %v2404_v31 = vpop.xlane.xlu0 %1136 }
 0x328   : > { %v1167_v35 = vpop.permute.xlu0 %1166 }
 0x329   : > { %vm2407_vm4 = vcmp.eq.s32.totalorder %v2384_v12, %v1167_v35 }
 0x32a   : > { %v1181_v41 = vsel %vm2407_vm4, %v2244_v45, 0.0  ;;  %v1173_v42 = vsel %vm2407_vm4, %v2236_v39, 0.0  ;;  %v1183_v47 = vsel %vm2407_vm4, %v2234_v34, 0.0  ;;  %v1175_v49 = vsel %vm2407_vm4, %v2232_v33, 0.0 }
 0x32b   : > { %v1213_v43 = vsel %vm938_vm2, %v1181_v41, 0.0  ;;  %v1189_v44 = vsel %vm938_vm2, %v1173_v42, 0.0  ;;  %v1219_v16 = vsel %vm938_vm2, %v1183_v47, 0.0  ;;  %v1195_v20 = vsel %vm938_vm2, %v1175_v49, 0.0  ;;  %v2009_v47 = vpop.eup %2008 }
 0x32c   : > { %1214 = vadd.xlane.f32.xlu0 %v1213_v43  ;;  %1190 = vadd.xlane.f32.xlu1 %v1189_v44  ;;  %v1185_v11 = vsel %vm2407_vm4, %v2276_v5, 0.0  ;;  %v1198_v41 = vsel %vm938_vm2, %v1176_v25, 0.0  ;;  %v1187_v42 = vsel %vm2407_vm4, %v2284_v9, 0.0  ;;  %v1177_v43 = vsel %vm2407_vm4, %v2268_v1, 0.0 }
 0x32d   : > { %v1225_v35 = vsel %vm938_vm2, %v1185_v11, 0.0  ;;  %v1046_v44 = vmul.f32 0.0, %v2007_v27  ;;  %v1081_v49 = vmul.f32 1.442695, %v1058_v28  ;;  %v1178_v11 = vsel %vm2387_vm3, %v2278_v6, 0.0 }
 0x32e   : > { %v1044_v25 = vmul.f32 0.0, %v2009_v47  ;;  %v1056_v27 = vsub.f32 %v2278_v6, %v2367_v52  ;;  %v1204_v28 = vsel %vm938_vm2, %v1178_v11, 0.0  ;;  %v1179_v32 = vsel %vm2407_vm4, %v2260_v61, 0.0 }
 0x32f   : > { %v1158_v14 = vadd.f32 %v1134_v60, %v1046_v44  ;;  %2012 = vpow2.f32 %v1081_v49  ;;  %v989_v47 = vsub.f32 -inf, %v2296_v18 }
 0x330   : > { %1220 = vadd.xlane.f32.xlu0 %v1219_v16  ;;  %1196 = vadd.xlane.f32.xlu1 %v1195_v20  ;;  %v1231_v16 = vsel %vm938_vm2, %v1187_v42, 0.0  ;;  %v1201_v20 = vsel %vm938_vm2, %v1177_v43, 0.0  ;;  %v1156_v60 = vadd.f32 %v2379_v4, %v1044_v25  ;;  %v1207_v42 = vsel %vm938_vm2, %v1179_v32, 0.0  ;;  %v2011_v43 = vpop.eup %2010 }
 0x331   : > { %2014 = vlog2.f32 %v1158_v14  ;;  %v1180_v4 = vsel %vm2387_vm3, %v2262_v62, 0.0  ;;  %v1254_v63 = vmul.f32 0.6931472, %v2011_v43  ;;  %v995_v32 = vsub.f32 -inf, %v2314_v30 }
 0x332   : > { %2016 = vpow2.f32 %v1097_v26  ;;  %v1210_v36 = vsel %vm938_vm2, %v1180_v4, 0.0 }
 0x333   : > { %2018 = vlog2.f32 %v1156_v60 }
 0x334   : > { %1226 = vadd.xlane.f32.xlu0 %v1225_v35  ;;  %1199 = vadd.xlane.f32.xlu1 %v1198_v41  ;;  %v1077_v35 = vmul.f32 1.442695, %v1056_v27  ;;  %v1064_v41 = vsub.f32 %v2286_v10, %v2369_v53  ;;  %v2468_v27 = vadd.f32 %v1254_v63, %v2306_v24  ;;  %v990_v24 = vsub.f32 -inf, %v2304_v23 }
 0x336   : > { %2020 = vpow2.f32 %v1077_v35  ;;  %v1093_v44 = vmul.f32 1.442695, %v1064_v41  ;;  %v1301_v43 = vsub.f32 %v2236_v39, %v2468_v27  ;;  %v1009_v63 = vmul.f32 1.442695, %v990_v24 }
 0x337   : > { %v988_v39 = vsub.f32 -inf, %v2322_v38  ;;  %v1186_v24 = vsel %vm2387_vm3, %v2286_v10, 0.0 }
 0x338   : > { %1232 = vadd.xlane.f32.xlu0 %v1231_v16  ;;  %1202 = vadd.xlane.f32.xlu1 %v1201_v20  ;;  %2022 = vpow2.f32 %v1093_v44  ;;  %v1007_v16 = vmul.f32 1.442695, %v989_v47  ;;  %v997_v20 = vsub.f32 -inf, %v2298_v19  ;;  %v1019_v44 = vmul.f32 1.442695, %v995_v32 }
 0x339   : > { %v2013_v49 = vpop.eup %2012 }
 0x33a   : > { %v1120_v11 = vsel %vm938_vm2, %v2013_v49, 0.0  ;;  %2024 = vpow2.f32 %v1007_v16 }
 0x33b   : > { %v2015_v14 = vpop.eup %2014 }
 0x33c   : > { %1205 = vadd.xlane.f32.xlu1 %v1204_v28  ;;  %v2017_v25 = vpop.eup %2016  ;;  %v1276_v26 = vmul.f32 0.6931472, %v2015_v14  ;;  %v1023_v28 = vmul.f32 1.442695, %v997_v20 }
 0x33d   : > { %v2019_v60 = vpop.eup %2018  ;;  %v1144_v35 = vsel %vm938_vm2, %v2017_v25, 0.0  ;;  %v993_v25 = vsub.f32 -inf, %v2328_v48 }
 0x33e   : > { %v1272_v4 = vmul.f32 0.6931472, %v2019_v60  ;;  %2026 = vpow2.f32 %v1023_v28  ;;  %v1184_v28 = vsel %vm2387_vm3, %v2246_v46, 0.0 }
 0x33f   : > { %2028 = vpow2.f32 %v1019_v44 }
 0x340   : > { %1208 = vadd.xlane.f32.xlu1 %v1207_v42  ;;  %v2021_v41 = vpop.eup %2020  ;;  %v2473_v42 = vadd.f32 %v1276_v26, %v2312_v29  ;;  %v2480_v49 = vadd.f32 %v1272_v4, %v2320_v37  ;;  %v1182_v37 = vsel %vm2387_vm3, %v2254_v56, 0.0  ;;  %2030 = vpow2.f32 %v1009_v63 }
 0x341   : > { %v1114_v47 = vsel %vm938_vm2, %v2021_v41, 0.0  ;;  %v1216_v26 = vsel %vm938_vm2, %v1182_v37, 0.0  ;;  %v1015_v41 = vmul.f32 1.442695, %v993_v25  ;;  %v1222_v4 = vsel %vm938_vm2, %v1184_v28, 0.0 }
 0x342   : > { %v1312_v29 = vsub.f32 %v2246_v46, %v2473_v42  ;;  %v1310_v16 = vsub.f32 %v2254_v56, %v2480_v49  ;;  %v991_v56 = vsub.f32 -inf, %v2333_v57 }
 0x344   : > { %1211 = vadd.xlane.f32.xlu1 %v1210_v36  ;;  %v2023_v36 = vpop.eup %2022  ;;  %v1011_v46 = vmul.f32 1.442695, %v991_v56 }
 0x345   : > { %v1138_v14 = vsel %vm938_vm2, %v2023_v36, 0.0  ;;  %v2025_v20 = vpop.eup %2024 }
 0x346   : > { %v1037_v60 = vmul.f32 0.0, %v2025_v20 }
 0x348   : > { %1121 = vadd.xlane.f32.xlu1 %v1120_v11  ;;  %v1005_v11 = vmul.f32 1.442695, %v988_v39  ;;  %v2027_v32 = vpop.eup %2026 }
 0x349   : > { %v2029_v44 = vpop.eup %2028 }
 0x34a   : > { %2032 = vpow2.f32 %v1005_v11  ;;  %v1043_v36 = vmul.f32 0.0, %v2029_v44  ;;  %v2031_v63 = vpop.eup %2030 }
 0x34c   : > { %1145 = vadd.xlane.f32.xlu1 %v1144_v35  ;;  %v1149_v35 = vadd.f32 %v2371_v54, %v1037_v60  ;;  %v1228_v54 = vsel %vm938_vm2, %v1186_v24, 0.0  ;;  %v1155_v39 = vadd.f32 %v2381_v7, %v1043_v36 }
 0x34e   : > { %1350 = vperm.xlu0 %1972, %v1301_v43   ;;  %v1045_v43 = vmul.f32 0.0, %v2027_v32  ;;  %2034 = vlog2.f32 %v1149_v35 }
 0x34f   : > { %2036 = vpow2.f32 %v1015_v41 }
 0x350   : > { %1115 = vadd.xlane.f32.xlu1 %v1114_v47  ;;  %v1157_v47 = vadd.f32 %v2375_v59, %v1045_v43 }
 0x352   : > { %1383 = vperm.xlu0 %1972, %v1312_v29   ;;  %v1188_v29 = vsel %vm2387_vm3, %v2270_v2, 0.0  ;;  %2038 = vlog2.f32 %v1157_v47 }
 0x353   : > { %2040 = vpow2.f32 %v1011_v46 }
 0x354   : > { %1139 = vadd.xlane.f32.xlu1 %v1138_v14  ;;  %v1234_v14 = vsel %vm938_vm2, %v1188_v29, 0.0  ;;  %v2033_v59 = vpop.eup %2032  ;;  %2042 = vlog2.f32 %v1155_v39 }
 0x355   : > { %v1036_v11 = vmul.f32 0.0, %v2033_v59 }
 0x356   : > { %1377 = vperm.xlu0 %1972, %v1310_v16   ;;  %v1038_v16 = vmul.f32 0.0, %v2031_v63 }
 0x357   : > { %v1148_v15 = vadd.f32 %v2377_v3, %v1036_v11  ;;  %v1001_v11 = vsub.f32 -inf, %v2341_v8 }
 0x358   : > { %1217 = vadd.xlane.f32.xlu1 %v1216_v26  ;;  %v1150_v37 = vadd.f32 %v2373_v58, %v1038_v16  ;;  %v2035_v20 = vpop.eup %2034  ;;  %v999_v16 = vsub.f32 -inf, %v2337_v0 }
 0x359   : > { %v2037_v25 = vpop.eup %2036  ;;  %v1258_v26 = vmul.f32 0.6931472, %v2035_v20 }
 0x35a   : > { %2044 = vlog2.f32 %v1150_v37  ;;  %v1041_v28 = vmul.f32 0.0, %v2037_v25  ;;  %v1027_v20 = vmul.f32 1.442695, %v999_v16 }
 0x35b   : > { %2046 = vlog2.f32 %v1148_v15  ;;  %v1287_v35 = vadd.f32 %v1258_v26, %v2296_v18 }
 0x35c   : > { %1223 = vadd.xlane.f32.xlu1 %v1222_v4  ;;  %v2039_v60 = vpop.eup %2038  ;;  %v1153_v7 = vadd.f32 %v2394_v17, %v1041_v28 }
 0x35d   : > { %v2041_v32 = vpop.eup %2040  ;;  %v1274_v41 = vmul.f32 0.6931472, %v2039_v60  ;;  %v1303_v3 = vsub.f32 %v2232_v33, %v1287_v35 }
 0x35e   : > { %v2043_v56 = vpop.eup %2042  ;;  %v1039_v4 = vmul.f32 0.0, %v2041_v32  ;;  %2048 = vlog2.f32 %v1153_v7  ;;  %v1002_v7 = vsub.f32 -inf, %v2365_v51 }
 0x35f   : > { %v2515_v43 = vadd.f32 %v1274_v41, %v2298_v19  ;;  %v1270_v24 = vmul.f32 0.6931472, %v2043_v56 }
 0x360   : > { %1229 = vadd.xlane.f32.xlu1 %v1228_v54  ;;  %v1151_v58 = vadd.f32 %v2400_v22, %v1039_v4 }
 0x361   : > { %v2519_v17 = vadd.f32 %v1270_v24, %v2314_v30  ;;  %v1311_v18 = vsub.f32 %v2234_v34, %v2515_v43 }
 0x362   : > { %2050 = vlog2.f32 %v1151_v58  ;;  %v992_v58 = vsub.f32 -inf, %v2367_v52 }
 0x363   : > { %v1309_v19 = vsub.f32 %v2244_v45, %v2519_v17  ;;  %2052 = vpow2.f32 %v1027_v20 }
 0x364   : > { %1235 = vadd.xlane.f32.xlu1 %v1234_v14  ;;  %v2045_v44 = vpop.eup %2044 }
 0x365   : > { %v1260_v47 = vmul.f32 0.6931472, %v2045_v44  ;;  %v2047_v46 = vpop.eup %2046 }
 0x366   : > { %v1256_v54 = vmul.f32 0.6931472, %v2047_v46 }
 0x367   : > { %v1288_v22 = vadd.f32 %v1260_v47, %v2304_v23  ;;  %v1013_v47 = vmul.f32 1.442695, %v992_v58 }
 0x368   : > { %v2049_v36 = vpop.eup %2048  ;;  %v1286_v33 = vadd.f32 %v1256_v54, %v2322_v38 }
 0x369   : > { %v1266_v29 = vmul.f32 0.6931472, %v2049_v36  ;;  %v1304_v63 = vsub.f32 %v2238_v40, %v1288_v22 }
 0x36a   : > { %v1302_v14 = vsub.f32 %v2252_v55, %v1286_v33  ;;  %v994_v55 = vsub.f32 -inf, %v2363_v50 }
 0x36b   : > { %v2529_v39 = vadd.f32 %v1266_v29, %v2328_v48  ;;  %v1401_v48 = vadd.s32 4294967288, %v2384_v12 }
 0x36c   : > { %v2051_v30 = vpop.eup %2050  ;;  %v1017_v60 = vmul.f32 1.442695, %v994_v55 }
 0x36d   : > { %v1262_v34 = vmul.f32 0.6931472, %v2051_v30  ;;  %v1307_v45 = vsub.f32 %v2260_v61, %v2529_v39  ;;  %v2053_v46 = vpop.eup %2052 }
 0x36e   : > { %2054 = vpow2.f32 %v1017_v60  ;;  %v1047_v36 = vmul.f32 0.0, %v2053_v46 }
 0x36f   : > { %v2533_v23 = vadd.f32 %v1262_v34, %v2333_v57  ;;  %v2544_v57 = vsub.s32 %v2384_v12, %v2209_v13  ;;  %v1031_v12 = vmul.f32 1.442695, %v1001_v11 }
 0x371   : > { %v1305_v38 = vsub.f32 %v2268_v1, %v2533_v23  ;;  %v2549_v1 = vsub.s32 %v1401_v48, %v2209_v13  ;;  %2056 = vpow2.f32 %v1031_v12 }
 0x375   : > { %1356 = vperm.xlu1 %1971, %v1303_v3   ;;  %v1033_v3 = vmul.f32 1.442695, %v1002_v7 }
 0x377   : > { %2058 = vpow2.f32 %v1033_v3 }
 0x378   : > { %2060 = vpow2.f32 %v1013_v47 }
 0x379   : > { %1380 = vperm.xlu1 %1971, %v1311_v18   ;;  %v1000_v18 = vsub.f32 -inf, %v2369_v53 }
 0x37b   : > { %v1029_v54 = vmul.f32 1.442695, %v1000_v18 }
 0x37d   : > { %1374 = vperm.xlu1 %1971, %v1309_v19   ;;  %v2055_v19 = vpop.eup %2054  ;;  %2062 = vpow2.f32 %v1029_v54 }
 0x37e   : > { %v1042_v34 = vmul.f32 0.0, %v2055_v19 }
 0x381   : > { %1359 = vperm.xlu1 %1971, %v1304_v63   ;;  %v1159_v63 = vadd.f32 %v2404_v31, %v1047_v36 }
 0x383   : > { %2064 = vlog2.f32 %v1159_v63 }
 0x385   : > { %1353 = vperm.xlu1 %1971, %v1302_v14  }
 0x389   : > { %1368 = vperm.xlu1 %1971, %v1307_v45  }
 0x38d   : > { %1362 = vperm.xlu1 %1971, %v1305_v38  }
 0x3a1   : > { %v1194_v59 = vpop.xlane.xlu0 %1193 }
 0x3a2   : > { %v1318_v25 = vsub.f32 %v1194_v59, %v1286_v33  ;;  %v2057_v33 = vpop.eup %2056 }
 0x3a3   : > { %v1049_v30 = vmul.f32 0.0, %v2057_v33  ;;  %v2059_v45 = vpop.eup %2058 }
 0x3a4   : > { %v2061_v16 = vpop.eup %2060  ;;  %v1050_v48 = vmul.f32 0.0, %v2059_v45 }
 0x3a5   : > { %v1161_v38 = vadd.f32 %v2397_v21, %v1049_v30  ;;  %v1040_v55 = vmul.f32 0.0, %v2061_v16 }
 0x3b9   : > { %v1191_v40 = vpop.xlane.xlu1 %1190  ;;  %v1215_v20 = vpop.xlane.xlu0 %1214 }
 0x3ba   : > { %v1317_v61 = vsub.f32 %v1191_v40, %v2468_v27  ;;  %v1544_v27 = vrot.slane %v1318_v25, %v2549_v1  ;;  %v1325_v36 = vsub.f32 %v1215_v20, %v2519_v17 }
 0x3bc   : > { %v1540_v28 = vrot.slane %v1317_v61, %v2544_v57  ;;  %v2063_v61 = vpop.eup %2062 }
 0x3bd   : > { %v1197_v37 = vpop.xlane.xlu1 %1196  ;;  %v2065_v25 = vpop.eup %2064 }
 0x3be   : > { %v1319_v15 = vsub.f32 %v1197_v37, %v1287_v35  ;;  %v1545_v35 = vsel %vm1406_vm5, %v1544_v27, %v1540_v28  ;;  %v1278_v28 = vmul.f32 0.6931472, %v2065_v25 }
 0x3c0   : > { %v1549_v41 = vrot.slane %v1319_v15, %v2544_v57  ;;  %v1048_v15 = vmul.f32 0.0, %v2063_v61 }
 0x3c1   : > { %v1200_v26 = vpop.xlane.xlu1 %1199 }
 0x3c2   : > { %v1320_v32 = vsub.f32 %v1200_v26, %v1288_v22 }
 0x3c4   : > { %v1553_v13 = vrot.slane %v1320_v32, %v2549_v1  ;;  %v1221_v32 = vpop.xlane.xlu0 %1220 }
 0x3c5   : > { %v2556_v56 = vpop.xlane.xlu1 %1202  ;;  %v1327_v17 = vsub.f32 %v1221_v32, %v2515_v43 }
 0x3c6   : > { %v1554_v4 = vsel %vm1406_vm5, %v1553_v13, %v1549_v41 }
 0x3c7   : > { %v2562_v24 = vsel %vm1471_vm6, %v1554_v4, %v1545_v35  ;;  %v1297_v35 = vadd.f32 %v1278_v28, %v2337_v0  ;;  %v1321_v0 = vsub.f32 %v2556_v56, %v2533_v23 }
 0x3c8   : > { %v1227_v3 = vpop.xlane.xlu0 %1226 }
 0x3c9   : > { %v2564_v44 = vpop.xlane.xlu1 %1205  ;;  %v1313_v19 = vsub.f32 %v2276_v5, %v1297_v35  ;;  %v1329_v56 = vsub.f32 %v1227_v3, %v1297_v35 }
 0x3cb   : > { %v1594_v61 = vrot.slane %v1329_v56, %v2544_v57 }
 0x3cd   : > { %v2567_v22 = vpop.xlane.xlu1 %1208 }
 0x3d1   : > { %v2569_v29 = vpop.xlane.xlu1 %1211 }
 0x3d5   : > { %v1122_v14 = vpop.xlane.xlu1 %1121 }
 0x3d6   : > { %v1154_v40 = vadd.f32 %v1122_v14, %v1042_v34 }
 0x3d8   : > { %2066 = vlog2.f32 %v1154_v40 }
 0x3d9   : > { %v1146_v59 = vpop.xlane.xlu1 %1145  ;;  %2068 = vlog2.f32 %v1161_v38 }
 0x3da   : > { %v1162_v37 = vadd.f32 %v1146_v59, %v1050_v48  ;;  %v1585_v59 = vrot.slane %v1327_v17, %v2544_v57 }
 0x3dc   : > { %2070 = vlog2.f32 %v1162_v37 }
 0x3dd   : > { %v1116_v11 = vpop.xlane.xlu1 %1115 }
 0x3de   : > { %v1152_v31 = vadd.f32 %v1116_v11, %v1040_v55 }
 0x3e0   : > { %2072 = vlog2.f32 %v1152_v31 }
 0x3e1   : > { %v1140_v26 = vpop.xlane.xlu1 %1139 }
 0x3e2   : > { %v2067_v60 = vpop.eup %2066  ;;  %v1160_v21 = vadd.f32 %v1140_v26, %v1048_v15 }
 0x3e3   : > { %v1268_v7 = vmul.f32 0.6931472, %v2067_v60  ;;  %v2069_v12 = vpop.eup %2068 }
 0x3e4   : > { %2074 = vlog2.f32 %v1160_v21  ;;  %v1282_v13 = vmul.f32 0.6931472, %v2069_v12 }
 0x3e5   : > { %v1292_v27 = vadd.f32 %v1268_v7, %v2363_v50  ;;  %v1218_v41 = vpop.xlane.xlu1 %1217 }
 0x3e6   : > { %v2071_v58 = vpop.eup %2070  ;;  %v1299_v46 = vadd.f32 %v1282_v13, %v2341_v8  ;;  %v1326_v63 = vsub.f32 %v1218_v41, %v2480_v49  ;;  %v1323_v8 = vsub.f32 %v2567_v22, %v2529_v39  ;;  %v1576_v49 = vrot.slane %v1325_v36, %v2544_v57 }
 0x3e7   : > { %v1308_v4 = vsub.f32 %v2262_v62, %v1292_v27  ;;  %v1324_v50 = vsub.f32 %v2569_v29, %v1292_v27  ;;  %v1284_v33 = vmul.f32 0.6931472, %v2071_v58  ;;  %v1233_v29 = vpop.xlane.xlu0 %1232  ;;  %v1558_v39 = vrot.slane %v1321_v0, %v2544_v57 }
 0x3e8   : > { %v1580_v22 = vrot.slane %v1326_v63, %v2549_v1  ;;  %v1331_v40 = vsub.f32 %v1233_v29, %v1299_v46  ;;  %v1315_v21 = vsub.f32 %v2284_v9, %v1299_v46 }
 0x3e9   : > { %1371 = vperm.xlu1 %1971, %v1308_v4   ;;  %v1224_v47 = vpop.xlane.xlu1 %1223  ;;  %v1571_v45 = vrot.slane %v1324_v50, %v2549_v1  ;;  %v1300_v38 = vadd.f32 %v1284_v33, %v2365_v51 }
 0x3ea   : > { %v2073_v18 = vpop.eup %2072  ;;  %v1328_v5 = vsub.f32 %v1224_v47, %v2473_v42  ;;  %v1581_v31 = vsel %vm1406_vm5, %v1580_v22, %v1576_v49 }
 0x3eb   : > { %v1264_v54 = vmul.f32 0.6931472, %v2073_v18 }
 0x3ec   : > { %v1589_v16 = vrot.slane %v1328_v5, %v2549_v1 }
 0x3ed   : > { %v1290_v62 = vadd.f32 %v1264_v54, %v2367_v52  ;;  %v1230_v30 = vpop.xlane.xlu1 %1229 }
 0x3ee   : > { %v2075_v34 = vpop.eup %2074  ;;  %v1590_v26 = vsel %vm1406_vm5, %v1589_v16, %v1585_v59 }
 0x3ef   : > { %v1322_v14 = vsub.f32 %v2564_v44, %v1290_v62  ;;  %v1280_v23 = vmul.f32 0.6931472, %v2075_v34  ;;  %v1306_v52 = vsub.f32 %v2278_v6, %v1290_v62  ;;  %v1567_v6 = vrot.slane %v1323_v8, %v2544_v57 }
 0x3f1   : > { %v1562_v42 = vrot.slane %v1322_v14, %v2549_v1  ;;  %v1298_v43 = vadd.f32 %v1280_v23, %v2369_v53  ;;  %1365 = vperm.xlu1 %1971, %v1306_v52   ;;  %v1236_v44 = vpop.xlane.xlu1 %1235  ;;  %v1572_v53 = vsel %vm1406_vm5, %v1571_v45, %v1567_v6 }
 0x3f2   : > { %v1332_v48 = vsub.f32 %v1236_v44, %v1300_v38 }
 0x3f3   : > { %v1563_v51 = vsel %vm1406_vm5, %v1562_v42, %v1558_v39  ;;  %v1330_v37 = vsub.f32 %v1230_v30, %v1298_v43  ;;  %v1314_v55 = vsub.f32 %v2286_v10, %v1298_v43  ;;  %v1603_v10 = vrot.slane %v1331_v40, %v2544_v57 }
 0x3f4   : > { %v1607_v20 = vrot.slane %v1332_v48, %v2549_v1  ;;  %v1610_v11 = vsel %vm1473_vm7, %v1563_v51, %v2562_v24  ;;  %v1316_v24 = vsub.f32 %v2270_v2, %v1300_v38  ;;  %v1351_v2 = vpop.permute.xlu0 %1350 }
 0x3f5   : > { %v1598_v25 = vrot.slane %v1330_v37, %v2549_v1  ;;  %1386 = vperm.xlu1 %1971, %v1313_v19   ;;  %1389 = vperm.xlu0 %1972, %v1314_v55   ;;  %v1611_v15 = vsel %vm1475_vm8, %v1572_v53, %v1610_v11  ;;  %v1357_v41 = vpop.permute.xlu1 %1356  ;;  %v1400_v54 = vrot.slane %v1351_v2, %v2544_v57 }
 0x3f6   : > { %v1612_v60 = vsel %vm1477_vm9, %v1581_v31, %v1611_v15  ;;  %v1608_v7 = vsel %vm1406_vm5, %v1607_v20, %v1603_v10  ;;  %v1411_v50 = vrot.slane %v1357_v41, %v2544_v57 }
 0x3f7   : > { %v1599_v28 = vsel %vm1406_vm5, %v1598_v25, %v1594_v61  ;;  %v1613_v32 = vsel %vm1479_vm10, %v1590_v26, %v1612_v60 }
 0x3f8   : > { %v1614_v12 = vsel %vm1481_vm11, %v1599_v28, %v1613_v32  ;;  %v1384_v47 = vpop.permute.xlu0 %1383 }
 0x3f9   : > { %1392 = vperm.xlu1 %1971, %v1315_v21   ;;  %1395 = vperm.xlu0 %1972, %v1316_v24   ;;  %v1615_v27 = vsel %vm1483_vm12, %v1608_v7, %v1614_v12  ;;  %v1381_v13 = vpop.permute.xlu1 %1380  ;;  %v1451_v52 = vrot.slane %v1384_v47, %v2549_v1 }
 0x3fa   : > { %v1447_v29 = vrot.slane %v1381_v13, %v2544_v57 }
 0x3fc   : > { %v1378_v36 = vpop.permute.xlu0 %1377  ;;  %v1452_v40 = vsel %vm1406_vm5, %v1451_v52, %v1447_v29 }
 0x3fd   : > { %v1375_v35 = vpop.permute.xlu1 %1374  ;;  %v1442_v17 = vrot.slane %v1378_v36, %v2549_v1 }
 0x3fe   : > { %v1438_v63 = vrot.slane %v1375_v35, %v2544_v57 }
 0x400   : > { %v1443_v39 = vsel %vm1406_vm5, %v1442_v17, %v1438_v63 }
 0x401   : > { %v1360_v4 = vpop.permute.xlu1 %1359 }
 0x402   : > { %v1415_v19 = vrot.slane %v1360_v4, %v2549_v1 }
 0x404   : > { %v1416_v8 = vsel %vm1406_vm5, %v1415_v19, %v1411_v50 }
 0x405   : > { %v1354_v9 = vpop.permute.xlu1 %1353 }
 0x406   : > { %v1405_v18 = vrot.slane %v1354_v9, %v2549_v1 }
 0x408   : > { %v1407_v33 = vsel %vm1406_vm5, %v1405_v18, %v1400_v54 }
 0x409   : > { %v1369_v58 = vpop.permute.xlu1 %1368  ;;  %v1472_v14 = vsel %vm1471_vm6, %v1416_v8, %v1407_v33 }
 0x40a   : > { %v1429_v5 = vrot.slane %v1369_v58, %v2544_v57 }
 0x40d   : > { %v1363_v3 = vpop.permute.xlu1 %1362 }
 0x40e   : > { %v1420_v30 = vrot.slane %v1363_v3, %v2544_v57 }
 0x417   : > { %1617 = vxpose.xlu0.b32.start.end [1/1] (short) (narrow) %v1615_v27, 16 }
 0x468   : > { %v1372_v46 = vpop.permute.xlu1 %1371 }
 0x469   : > { %v1433_v0 = vrot.slane %v1372_v46, %v2549_v1 }
 0x46b   : > { %v1434_v49 = vsel %vm1406_vm5, %v1433_v0, %v1429_v5 }
 0x470   : > { %v1366_v62 = vpop.permute.xlu1 %1365 }
 0x471   : > { %v1424_v34 = vrot.slane %v1366_v62, %v2549_v1 }
 0x473   : > { %v1425_v23 = vsel %vm1406_vm5, %v1424_v34, %v1420_v30 }
 0x474   : > { %v1474_v56 = vsel %vm1473_vm7, %v1425_v23, %v1472_v14  ;;  %v1387_v45 = vpop.permute.xlu1 %1386  ;;  %v1390_v38 = vpop.permute.xlu0 %1389 }
 0x475   : > { %v1476_v42 = vsel %vm1475_vm8, %v1434_v49, %v1474_v56  ;;  %v1456_v22 = vrot.slane %v1387_v45, %v2544_v57  ;;  %v1460_v43 = vrot.slane %v1390_v38, %v2549_v1 }
 0x476   : > { %v1478_v44 = vsel %vm1477_vm9, %v1443_v39, %v1476_v42 }
 0x477   : > { %v1461_v6 = vsel %vm1406_vm5, %v1460_v43, %v1456_v22  ;;  %v1480_v59 = vsel %vm1479_vm10, %v1452_v40, %v1478_v44 }
 0x478   : > { %v1393_v16 = vpop.permute.xlu1 %1392  ;;  %v1396_v48 = vpop.permute.xlu0 %1395  ;;  %v1482_v61 = vsel %vm1481_vm11, %v1461_v6, %v1480_v59 }
 0x479   : > { %v1465_v51 = vrot.slane %v1393_v16, %v2544_v57  ;;  %v1469_v37 = vrot.slane %v1396_v48, %v2549_v1 }
 0x47b   : > { %v1470_v55 = vsel %vm1406_vm5, %v1469_v37, %v1465_v51 }
 0x47c   : > { %v1484_v20 = vsel %vm1483_vm12, %v1470_v55, %v1482_v61 }
 0x47d   : > { %1486 = vxpose.xlu1.b32.start.end [1/1] (short) (narrow) %v1484_v20, 16 }
 0x497   : > { %v1633_v53 = vpop.trf.xlu0 }
 0x498   : > { %1649 = vst.msk [vmem:[%s508_s12] sm:$0xff] %vm1518_vm13, %v1633_v53 }
 0x49b   : > { %v1634_v11 = vpop.trf.xlu0 }
 0x49c   : > { %1650 = vst.msk [vmem:[%s508_s12 + $0x8] sm:$0xff] %vm1518_vm13, %v1634_v11 }
 0x4fd   : > { %v1502_v57 = vpop.trf.xlu1 }
 0x4fe   : > { %1519 = vst.msk [vmem:[%s495_s19] sm:$0xff] %vm1518_vm13, %v1502_v57 }
 0x501   : > { %v1503_v1 = vpop.trf.xlu1 }
 0x502   : > { %1520 = vst.msk [vmem:[%s495_s19 + $0x8] sm:$0xff] %vm1518_vm13, %v1503_v1 }
 0x503 PF: > { %s21_s15 = sadd.s32 1, %s2098_s15   ;;  %s2683_s13 = smov %s2094_s14 }
 0x504   : > { %p18_p5 = scmp.ge.s32.totalorder %s21_s15, 4   ;;  %s2684_s14 = smov %s2686_s16 }
 0x506   :  { %20 = sbr.rel (!%p18_p5) target bundleno = 2 (0x2), region = 108 }

</bundles_post_ra>
